<compile_context>
chip_gen: v7x
topology: tpu7x:2x2x1
jax: 0.10.0
libtpu: 0.0.40
codegen_flags: <defaults>
</compile_context>

<pallas_src>
import math
import jax
import jax.numpy as jnp
from jax.experimental import pallas as pl
from jax.experimental.pallas import tpu as pltpu

FEATURE_NUM = 12


# ------------------------------------------------------------------ kernel ---
def rits_kernel(
    values_ref, masks_ref, deltas_ref, evals_ref, emasks_ref,   # (T*B, F) flattened time-major
    Wdecay_ref, bdecay_ref,        # (F, H+F), (1, H+F)   : [temp_decay_h | temp_decay_x(diag)]
    Whfused_ref, bhist_ref,        # (H, 4H+F), (1, F)    : [W_hh | hist_reg]   (gates [i,f,o,g])
    Wfeat_ref, bfeat_ref,          # (F, F), (1, F)       : feat_reg (off-diag masked)
    Wcomb_gx_ref, bcomb_ref,       # (F, F), (1, F)       : weight_combine, gamma_x half
    Wmfused_ref, blstm_ref,        # (F, 4H+F), (1, 4H)   : [W_ih(m) | W_comb(m)], b_ih+b_hh
    Wih_cc_ref,                    # (F, 4H)              : W_ih (c_c half)      (gates [i,f,o,g])
    imput_ref, loss_ref,           # outputs: (T, B, F), (1, 1)
):
    T, B, F = imput_ref.shape
    TB = T * B
    H4 = Wih_cc_ref.shape[1]       # 4H (== 128)
    H = H4 // 4
    H3 = 3 * H

    # ---- weights resident for the whole recurrence -------------------------
    Wdecay = Wdecay_ref[...]
    bdecay = bdecay_ref[...]
    Whfused = Whfused_ref[...]
    Wfeat = Wfeat_ref[...]
    Wcomb_gx = Wcomb_gx_ref[...]
    Wmfused = Wmfused_ref[...]
    Wih_cc = Wih_cc_ref[...]
    blstm = blstm_ref[...]

    # bias broadcasts hoisted once (unrolled loop would re-emit them per step)
    bhist_b = jnp.broadcast_to(bhist_ref[...], (B, F))
    bfeat_b = jnp.broadcast_to(bfeat_ref[...], (B, F))

    # ---- sequences ----------------------------------------------------------
    x_all = values_ref[...]        # (TB, F)
    m_all = masks_ref[...]
    d_all = deltas_ref[...]
    truth_all = evals_ref[...]
    mt_all = emasks_ref[...]

    # h-independent elementwise precompute
    mx_all = m_all * x_all
    om_all = 1.0 - m_all

    # per-step loss weights: eval_mask / (sum(eval_mask) + 1e-5)  (exact divide)
    w_steps = []
    for t in range(T):
        seg = mt_all[t * B:(t + 1) * B]
        w_steps.append(seg * (1.0 / (jnp.sum(seg) + 1e-5)))

    # ---- batched (over T) h-independent matmuls -----------------------------
    decay = jnp.exp(-jax.nn.relu(
        jnp.dot(d_all, Wdecay, preferred_element_type=jnp.float32) + bdecay))   # (TB, H+F)
    gamma_h_all = decay[:, :H]            # (TB, H)
    gamma_x_all = decay[:, H:]            # (TB, F)

    m_out = jnp.dot(m_all, Wmfused, preferred_element_type=jnp.float32)          # (TB, 4H+F)
    gates_m_all = m_out[:, :H4] + blstm   # LSTM biases folded once
    alpha_all = (jnp.dot(gamma_x_all, Wcomb_gx, preferred_element_type=jnp.float32)
                 + m_out[:, H4:] + bcomb_ref[...])                                # (TB, F)
    om_alpha_all = 1.0 - alpha_all

    # ---- serial recurrence (only h-dependent work remains) ------------------
    h = jnp.zeros((B, H), jnp.float32)
    c = jnp.zeros((B, H), jnp.float32)
    loss_acc = jnp.zeros((B, F), jnp.float32)

    for t in range(T):
        lo = t * B
        hi = lo + B

        h = h * gamma_h_all[lo:hi]

        # fused: [W_hh contribution to LSTM gates | history regression]
        h_out = jnp.dot(h, Whfused, preferred_element_type=jnp.float32)   # (B, 4H+F)
        gates_h = h_out[:, :H4]
        x_h = h_out[:, H4:] + bhist_b

        mx = mx_all[lo:hi]
        om = om_all[lo:hi]
        truth = truth_all[lo:hi]
        w = w_steps[t]
        alpha = alpha_all[lo:hi]
        om_alpha = om_alpha_all[lo:hi]

        x_c = mx + om * x_h
        z_h = jnp.dot(x_c, Wfeat, preferred_element_type=jnp.float32) + bfeat_b
        c_h = alpha * z_h + om_alpha * x_h
        c_c = mx + om * c_h

        imput_ref[t] = c_c                  # resident output block

        # loss: elementwise accumulate, single reduce at the end
        loss_acc = loss_acc + (jnp.abs(truth - x_h)
                               + jnp.abs(truth - z_h)
                               + jnp.abs(truth - c_h)) * w

        # LSTMCell, gate columns ordered [i | f | o | g]
        gates = (jnp.dot(c_c, Wih_cc, preferred_element_type=jnp.float32)
                 + gates_m_all[lo:hi] + gates_h)          # (B, 4H)
        sig = jax.nn.sigmoid(gates[:, :H3])               # i, f, o
        g_g = jnp.tanh(gates[:, H3:])                     # g only
        i_g = sig[:, 0:H]
        f_g = sig[:, H:2 * H]
        o_g = sig[:, 2 * H:H3]

        c = f_g * c + i_g * g_g
        h = o_g * jnp.tanh(c)

    loss_ref[...] = jnp.sum(loss_acc) + jnp.zeros((1, 1), jnp.float32)


# ----------------------------------------------------------------- wrapper ---
def rits_forward_pallas(params, values, masks, deltas, evals, eval_masks,
                        impute_weight, label_weight):
    B, T, F = values.shape
    H = params["W_h"].shape[0]
    H4 = 4 * H
    eye = jnp.eye(F, dtype=jnp.float32)
    f32 = lambda a: a.astype(jnp.float32)

    # reorder LSTM gate rows from PyTorch [i,f,g,o] to [i,f,o,g] (sigmoid-contiguous)
    def reorder(w):
        return jnp.concatenate([w[:H], w[H:2 * H], w[3 * H:], w[2 * H:3 * H]], axis=0)

    W_ih_r = reorder(f32(params["W_ih"]))                  # (4H, 2F)
    W_hh_r = reorder(f32(params["W_hh"]))                  # (4H, H)
    blstm = reorder(f32(params["b_ih"]) + f32(params["b_hh"])).reshape(1, H4)

    # fused / pre-transposed weight slabs (glue, done once outside the kernel)
    Wdecay = jnp.concatenate([f32(params["W_h"]).T, (f32(params["W_x"]) * eye).T], axis=1)
    bdecay = jnp.concatenate([f32(params["b_h"]), f32(params["b_x"])]).reshape(1, H + F)

    Whfused = jnp.concatenate([W_hh_r.T, f32(params["W_hist"]).T], axis=1)   # (H, 4H+F)
    bhist = f32(params["b_hist"]).reshape(1, F)

    Wfeat = (f32(params["W_feat"]) * (1.0 - eye)).T        # (F, F) off-diag masked
    bfeat = f32(params["b_feat"]).reshape(1, F)

    Wcomb_t = f32(params["W_comb"]).T                      # (2F, F)
    Wcomb_gx, Wcomb_m = Wcomb_t[:F], Wcomb_t[F:]
    bcomb = f32(params["b_comb"]).reshape(1, F)

    Wih_t = W_ih_r.T                                       # (2F, 4H)
    Wih_cc, Wih_m = Wih_t[:F], Wih_t[F:]
    Wmfused = jnp.concatenate([Wih_m, Wcomb_m], axis=1)    # (F, 4H+F)

    # sequences flattened time-major (T*B, F) so batched dots fill 64 sublanes
    to_flat = lambda a: jnp.transpose(f32(a), (1, 0, 2)).reshape(T * B, F)
    seqs = [to_flat(values), to_flat(masks), to_flat(deltas),
            to_flat(evals), to_flat(eval_masks)]

    weights = [Wdecay, bdecay, Whfused, bhist, Wfeat, bfeat,
               Wcomb_gx, bcomb, Wmfused, blstm, Wih_cc]

    seq_spec = pl.BlockSpec((T * B, F), lambda i: (0, 0))
    w_specs = [pl.BlockSpec(w.shape, lambda i: (0, 0)) for w in weights]

    out_shape = (
        jax.ShapeDtypeStruct((T, B, F), jnp.float32),      # imputations (time-major)
        jax.ShapeDtypeStruct((1, 1), jnp.float32),         # accumulated x_loss
    )
    out_specs = (
        pl.BlockSpec((T, B, F), lambda i: (0, 0, 0)),
        pl.BlockSpec((1, 1), lambda i: (0, 0)),
    )

    imps_tbf, x_loss = pl.pallas_call(
        rits_kernel,
        out_shape=out_shape,
        grid_spec=pltpu.PrefetchScalarGridSpec(
            num_scalar_prefetch=0,
            grid=(1,),                                     # single resident invocation
            in_specs=[seq_spec] * 5 + w_specs,
            out_specs=out_specs,
        ),
        compiler_params=pltpu.CompilerParams(
            dimension_semantics=("arbitrary",)),
    )(*seqs, *weights)

    loss = x_loss[0, 0] * impute_weight + 0.0 * label_weight
    imputations = jnp.transpose(imps_tbf, (1, 0, 2))       # back to (B, T, F)
    return {"loss": loss,
            "predictions": jnp.array(0, dtype=jnp.int32),
            "imputations": imputations,
            "evals": evals,
            "eval_masks": eval_masks}


# ----------------------------------------------------- pure-JAX reference ---
def rits_forward_ref(params, values, masks, deltas, evals, eval_masks,
                     impute_weight, label_weight):
    B, T, F = values.shape
    H = params["W_h"].shape[0]
    eye = jnp.eye(F, dtype=jnp.float32)
    h = jnp.zeros((B, H), jnp.float32)
    c = jnp.zeros((B, H), jnp.float32)
    x_loss = 0.0
    imps = []
    for t in range(T):
        x, m, d = values[:, t], masks[:, t], deltas[:, t]
        truth, mt = evals[:, t], eval_masks[:, t]
        gamma_h = jnp.exp(-jax.nn.relu(d @ params["W_h"].T + params["b_h"]))
        gamma_x = jnp.exp(-jax.nn.relu(d @ (params["W_x"] * eye).T + params["b_x"]))
        h = h * gamma_h
        x_h = h @ params["W_hist"].T + params["b_hist"]
        denom = jnp.sum(mt) + 1e-5
        x_loss += jnp.sum(jnp.abs(truth - x_h) * mt) / denom
        x_c = m * x + (1 - m) * x_h
        z_h = x_c @ (params["W_feat"] * (1 - eye)).T + params["b_feat"]
        x_loss += jnp.sum(jnp.abs(truth - z_h) * mt) / denom
        alpha = jnp.concatenate([gamma_x, m], 1) @ params["W_comb"].T + params["b_comb"]
        c_h = alpha * z_h + (1 - alpha) * x_h
        x_loss += jnp.sum(jnp.abs(truth - c_h) * mt) / denom
        c_c = m * x + (1 - m) * c_h
        inp = jnp.concatenate([c_c, m], 1)
        gates = inp @ params["W_ih"].T + params["b_ih"] + h @ params["W_hh"].T + params["b_hh"]
        i_g = jax.nn.sigmoid(gates[:, :H])
        f_g = jax.nn.sigmoid(gates[:, H:2 * H])
        g_g = jnp.tanh(gates[:, 2 * H:3 * H])
        o_g = jax.nn.sigmoid(gates[:, 3 * H:])
        c = f_g * c + i_g * g_g
        h = o_g * jnp.tanh(c)
        imps.append(c_c[:, None, :])
    return x_loss * impute_weight + 0.0 * label_weight, jnp.concatenate(imps, 1)


# -------------------------------------------------------------------- main ---
def init_params(key, hid, feat):
    ks = jax.random.split(key, 12)
    u = lambda k, shp, stdv: jax.random.uniform(k, shp, jnp.float32, -stdv, stdv)
    s_h = 1.0 / math.sqrt(hid)
    s_f = 1.0 / math.sqrt(feat)
    return {
        "W_h": u(ks[0], (hid, feat), s_h),   "b_h": u(ks[1], (hid,), s_h),
        "W_x": u(ks[2], (feat, feat), s_f),  "b_x": u(ks[3], (feat,), s_f),
        "W_hist": u(ks[4], (feat, hid), s_h), "b_hist": u(ks[5], (feat,), s_h),
        "W_feat": u(ks[6], (feat, feat), s_f), "b_feat": u(ks[7], (feat,), s_f),
        "W_comb": u(ks[8], (feat, 2 * feat), 1.0 / math.sqrt(2 * feat)),
        "b_comb": u(ks[9], (feat,), 1.0 / math.sqrt(2 * feat)),
        "W_ih": u(ks[10], (4 * hid, 2 * feat), s_h),
        "W_hh": u(ks[11], (4 * hid, hid), s_h),
        "b_ih": jnp.full((4 * hid,), 0.01, jnp.float32),
        "b_hh": jnp.full((4 * hid,), -0.01, jnp.float32),
    }


if __name__ == "__main__":
    # B=8 fills the (8,128) vreg sublane dimension; T*B=64 fills the batched dots.
    B, T, H, F = 8, 8, 32, FEATURE_NUM
    impute_weight, label_weight = 0.3, 1.0

    key = jax.random.PRNGKey(0)
    kp, k1, k2, k3, k4, k5 = jax.random.split(key, 6)
    params = init_params(kp, H, F)

    values = jax.random.normal(k1, (B, T, F), jnp.float32)
    masks = (jax.random.uniform(k2, (B, T, F)) > 0.3).astype(jnp.float32)
    deltas = jax.random.uniform(k3, (B, T, F), jnp.float32, 0.0, 3.0)
    evals = jax.random.normal(k4, (B, T, F), jnp.float32)
    eval_masks = (jax.random.uniform(k5, (B, T, F)) > 0.5).astype(jnp.float32)

    ret = jax.jit(
        lambda p, v, m, d, e, em: rits_forward_pallas(
            p, v, m, d, e, em, impute_weight, label_weight)
    )(params, values, masks, deltas, evals, eval_masks)
    jax.block_until_ready(ret)

    ref_loss, ref_imps = rits_forward_ref(
        params, values, masks, deltas, evals, eval_masks, impute_weight, label_weight)

    assert jnp.allclose(ret["loss"], ref_loss, rtol=1e-4, atol=1e-4), (ret["loss"], ref_loss)
    assert jnp.allclose(ret["imputations"], ref_imps, rtol=1e-4, atol=1e-4)
    # TODO(synk): nn.Dropout(p=0.25) and self.out Linear are defined in build()
    # but never used in forward() (y_loss==0, predictions==0); omitted.
    print("KERNEL_OK")
</pallas_src>

<mosaic_0001>
module attributes {stable_mosaic.version = 11 : i64} {
  func.func @rits_kernel(%arg0: i32, %arg1: memref<64x12xf32, #tpu.memory_space<vmem>>, %arg2: memref<64x12xf32, #tpu.memory_space<vmem>>, %arg3: memref<64x12xf32, #tpu.memory_space<vmem>>, %arg4: memref<64x12xf32, #tpu.memory_space<vmem>>, %arg5: memref<64x12xf32, #tpu.memory_space<vmem>>, %arg6: memref<12x44xf32, #tpu.memory_space<vmem>>, %arg7: memref<1x44xf32, #tpu.memory_space<vmem>>, %arg8: memref<32x140xf32, #tpu.memory_space<vmem>>, %arg9: memref<1x12xf32, #tpu.memory_space<vmem>>, %arg10: memref<12x12xf32, #tpu.memory_space<vmem>>, %arg11: memref<1x12xf32, #tpu.memory_space<vmem>>, %arg12: memref<12x12xf32, #tpu.memory_space<vmem>>, %arg13: memref<1x12xf32, #tpu.memory_space<vmem>>, %arg14: memref<12x140xf32, #tpu.memory_space<vmem>>, %arg15: memref<1x128xf32, #tpu.memory_space<vmem>>, %arg16: memref<12x128xf32, #tpu.memory_space<vmem>>, %arg17: memref<8x8x12xf32, #tpu.memory_space<vmem>>, %arg18: memref<1x1xf32, #tpu.memory_space<vmem>>) attributes {dimension_semantics = [#tpu.dimension_semantics<arbitrary>], iteration_bounds = array<i64: 1>, scalar_prefetch = 0 : i64, scratch_operands = 0 : i64, tpu.core_type = #tpu.core_type<tc>, window_params = [{pipeline_mode = #tpu.pipeline_mode<synchronous>, transform_indices = @transform_0, window_bounds = array<i64: 64, 12>}, {pipeline_mode = #tpu.pipeline_mode<synchronous>, transform_indices = @transform_1, window_bounds = array<i64: 64, 12>}, {pipeline_mode = #tpu.pipeline_mode<synchronous>, transform_indices = @transform_2, window_bounds = array<i64: 64, 12>}, {pipeline_mode = #tpu.pipeline_mode<synchronous>, transform_indices = @transform_3, window_bounds = array<i64: 64, 12>}, {pipeline_mode = #tpu.pipeline_mode<synchronous>, transform_indices = @transform_4, window_bounds = array<i64: 64, 12>}, {pipeline_mode = #tpu.pipeline_mode<synchronous>, transform_indices = @transform_5, window_bounds = array<i64: 12, 44>}, {pipeline_mode = #tpu.pipeline_mode<synchronous>, transform_indices = @transform_6, window_bounds = array<i64: 1, 44>}, {pipeline_mode = #tpu.pipeline_mode<synchronous>, transform_indices = @transform_7, window_bounds = array<i64: 32, 140>}, {pipeline_mode = #tpu.pipeline_mode<synchronous>, transform_indices = @transform_8, window_bounds = array<i64: 1, 12>}, {pipeline_mode = #tpu.pipeline_mode<synchronous>, transform_indices = @transform_9, window_bounds = array<i64: 12, 12>}, {pipeline_mode = #tpu.pipeline_mode<synchronous>, transform_indices = @transform_10, window_bounds = array<i64: 1, 12>}, {pipeline_mode = #tpu.pipeline_mode<synchronous>, transform_indices = @transform_11, window_bounds = array<i64: 12, 12>}, {pipeline_mode = #tpu.pipeline_mode<synchronous>, transform_indices = @transform_12, window_bounds = array<i64: 1, 12>}, {pipeline_mode = #tpu.pipeline_mode<synchronous>, transform_indices = @transform_13, window_bounds = array<i64: 12, 140>}, {pipeline_mode = #tpu.pipeline_mode<synchronous>, transform_indices = @transform_14, window_bounds = array<i64: 1, 128>}, {pipeline_mode = #tpu.pipeline_mode<synchronous>, transform_indices = @transform_15, window_bounds = array<i64: 12, 128>}, {pipeline_mode = #tpu.pipeline_mode<synchronous>, transform_indices = @transform_16, window_bounds = array<i64: 8, 8, 12>}, {pipeline_mode = #tpu.pipeline_mode<synchronous>, transform_indices = @transform_17, window_bounds = array<i64: 1, 1>}]} {
    %c0 = arith.constant 0 : index
    %c0_0 = arith.constant 0 : index
    %0 = vector.load %arg6[%c0, %c0_0] : memref<12x44xf32, #tpu.memory_space<vmem>>, vector<12x44xf32>
    %c0_1 = arith.constant 0 : index
    %c0_2 = arith.constant 0 : index
    %1 = vector.load %arg7[%c0_1, %c0_2] : memref<1x44xf32, #tpu.memory_space<vmem>>, vector<1x44xf32>
    %c0_3 = arith.constant 0 : index
    %c0_4 = arith.constant 0 : index
    %2 = vector.load %arg8[%c0_3, %c0_4] : memref<32x140xf32, #tpu.memory_space<vmem>>, vector<32x140xf32>
    %c0_5 = arith.constant 0 : index
    %c0_6 = arith.constant 0 : index
    %3 = vector.load %arg10[%c0_5, %c0_6] : memref<12x12xf32, #tpu.memory_space<vmem>>, vector<12x12xf32>
    %c0_7 = arith.constant 0 : index
    %c0_8 = arith.constant 0 : index
    %4 = vector.load %arg12[%c0_7, %c0_8] : memref<12x12xf32, #tpu.memory_space<vmem>>, vector<12x12xf32>
    %c0_9 = arith.constant 0 : index
    %c0_10 = arith.constant 0 : index
    %5 = vector.load %arg14[%c0_9, %c0_10] : memref<12x140xf32, #tpu.memory_space<vmem>>, vector<12x140xf32>
    %c0_11 = arith.constant 0 : index
    %c0_12 = arith.constant 0 : index
    %6 = vector.load %arg16[%c0_11, %c0_12] : memref<12x128xf32, #tpu.memory_space<vmem>>, vector<12x128xf32>
    %c0_13 = arith.constant 0 : index
    %c0_14 = arith.constant 0 : index
    %7 = vector.load %arg15[%c0_13, %c0_14] : memref<1x128xf32, #tpu.memory_space<vmem>>, vector<1x128xf32>
    %c0_15 = arith.constant 0 : index
    %c0_16 = arith.constant 0 : index
    %8 = vector.load %arg9[%c0_15, %c0_16] : memref<1x12xf32, #tpu.memory_space<vmem>>, vector<1x12xf32>
    %9 = vector.shape_cast %8 : vector<1x12xf32> to vector<1x12xf32>
    %10 = vector.broadcast %9 : vector<1x12xf32> to vector<8x12xf32>
    %c0_17 = arith.constant 0 : index
    %c0_18 = arith.constant 0 : index
    %11 = vector.load %arg11[%c0_17, %c0_18] : memref<1x12xf32, #tpu.memory_space<vmem>>, vector<1x12xf32>
    %12 = vector.shape_cast %11 : vector<1x12xf32> to vector<1x12xf32>
    %13 = vector.broadcast %12 : vector<1x12xf32> to vector<8x12xf32>
    %c0_19 = arith.constant 0 : index
    %c0_20 = arith.constant 0 : index
    %14 = vector.load %arg1[%c0_19, %c0_20] : memref<64x12xf32, #tpu.memory_space<vmem>>, vector<64x12xf32>
    %c0_21 = arith.constant 0 : index
    %c0_22 = arith.constant 0 : index
    %15 = vector.load %arg2[%c0_21, %c0_22] : memref<64x12xf32, #tpu.memory_space<vmem>>, vector<64x12xf32>
    %c0_23 = arith.constant 0 : index
    %c0_24 = arith.constant 0 : index
    %16 = vector.load %arg3[%c0_23, %c0_24] : memref<64x12xf32, #tpu.memory_space<vmem>>, vector<64x12xf32>
    %c0_25 = arith.constant 0 : index
    %c0_26 = arith.constant 0 : index
    %17 = vector.load %arg4[%c0_25, %c0_26] : memref<64x12xf32, #tpu.memory_space<vmem>>, vector<64x12xf32>
    %c0_27 = arith.constant 0 : index
    %c0_28 = arith.constant 0 : index
    %18 = vector.load %arg5[%c0_27, %c0_28] : memref<64x12xf32, #tpu.memory_space<vmem>>, vector<64x12xf32>
    %19 = arith.mulf %15, %14 : vector<64x12xf32>
    %cst = arith.constant 1.000000e+00 : f32
    %20 = vector.broadcast %cst : f32 to vector<64x12xf32>
    %21 = arith.subf %20, %15 : vector<64x12xf32>
    %22 = vector.extract_strided_slice %18 {offsets = [0, 0], sizes = [8, 12], strides = [1, 1]} : vector<64x12xf32> to vector<8x12xf32>
    %23 = vector.shape_cast %22 : vector<8x12xf32> to vector<1x8x12xf32>
    %cst_29 = arith.constant dense<0.000000e+00> : vector<1xf32>
    %24 = vector.multi_reduction <add>, %23, %cst_29 [1, 2] : vector<1x8x12xf32> to vector<1xf32>
    %25 = vector.shape_cast %24 : vector<1xf32> to vector<1x1x1xf32>
    %26 = vector.extract %25[0, 0, 0] : f32 from vector<1x1x1xf32>
    %cst_30 = arith.constant 9.99999974E-6 : f32
    %27 = arith.addf %26, %cst_30 : f32
    %cst_31 = arith.constant 1.000000e+00 : f32
    %28 = arith.divf %cst_31, %27 : f32
    %29 = vector.broadcast %28 : f32 to vector<8x12xf32>
    %30 = arith.mulf %22, %29 : vector<8x12xf32>
    %31 = vector.extract_strided_slice %18 {offsets = [8, 0], sizes = [8, 12], strides = [1, 1]} : vector<64x12xf32> to vector<8x12xf32>
    %32 = vector.shape_cast %31 : vector<8x12xf32> to vector<1x8x12xf32>
    %cst_32 = arith.constant dense<0.000000e+00> : vector<1xf32>
    %33 = vector.multi_reduction <add>, %32, %cst_32 [1, 2] : vector<1x8x12xf32> to vector<1xf32>
    %34 = vector.shape_cast %33 : vector<1xf32> to vector<1x1x1xf32>
    %35 = vector.extract %34[0, 0, 0] : f32 from vector<1x1x1xf32>
    %cst_33 = arith.constant 9.99999974E-6 : f32
    %36 = arith.addf %35, %cst_33 : f32
    %cst_34 = arith.constant 1.000000e+00 : f32
    %37 = arith.divf %cst_34, %36 : f32
    %38 = vector.broadcast %37 : f32 to vector<8x12xf32>
    %39 = arith.mulf %31, %38 : vector<8x12xf32>
    %40 = vector.extract_strided_slice %18 {offsets = [16, 0], sizes = [8, 12], strides = [1, 1]} : vector<64x12xf32> to vector<8x12xf32>
    %41 = vector.shape_cast %40 : vector<8x12xf32> to vector<1x8x12xf32>
    %cst_35 = arith.constant dense<0.000000e+00> : vector<1xf32>
    %42 = vector.multi_reduction <add>, %41, %cst_35 [1, 2] : vector<1x8x12xf32> to vector<1xf32>
    %43 = vector.shape_cast %42 : vector<1xf32> to vector<1x1x1xf32>
    %44 = vector.extract %43[0, 0, 0] : f32 from vector<1x1x1xf32>
    %cst_36 = arith.constant 9.99999974E-6 : f32
    %45 = arith.addf %44, %cst_36 : f32
    %cst_37 = arith.constant 1.000000e+00 : f32
    %46 = arith.divf %cst_37, %45 : f32
    %47 = vector.broadcast %46 : f32 to vector<8x12xf32>
    %48 = arith.mulf %40, %47 : vector<8x12xf32>
    %49 = vector.extract_strided_slice %18 {offsets = [24, 0], sizes = [8, 12], strides = [1, 1]} : vector<64x12xf32> to vector<8x12xf32>
    %50 = vector.shape_cast %49 : vector<8x12xf32> to vector<1x8x12xf32>
    %cst_38 = arith.constant dense<0.000000e+00> : vector<1xf32>
    %51 = vector.multi_reduction <add>, %50, %cst_38 [1, 2] : vector<1x8x12xf32> to vector<1xf32>
    %52 = vector.shape_cast %51 : vector<1xf32> to vector<1x1x1xf32>
    %53 = vector.extract %52[0, 0, 0] : f32 from vector<1x1x1xf32>
    %cst_39 = arith.constant 9.99999974E-6 : f32
    %54 = arith.addf %53, %cst_39 : f32
    %cst_40 = arith.constant 1.000000e+00 : f32
    %55 = arith.divf %cst_40, %54 : f32
    %56 = vector.broadcast %55 : f32 to vector<8x12xf32>
    %57 = arith.mulf %49, %56 : vector<8x12xf32>
    %58 = vector.extract_strided_slice %18 {offsets = [32, 0], sizes = [8, 12], strides = [1, 1]} : vector<64x12xf32> to vector<8x12xf32>
    %59 = vector.shape_cast %58 : vector<8x12xf32> to vector<1x8x12xf32>
    %cst_41 = arith.constant dense<0.000000e+00> : vector<1xf32>
    %60 = vector.multi_reduction <add>, %59, %cst_41 [1, 2] : vector<1x8x12xf32> to vector<1xf32>
    %61 = vector.shape_cast %60 : vector<1xf32> to vector<1x1x1xf32>
    %62 = vector.extract %61[0, 0, 0] : f32 from vector<1x1x1xf32>
    %cst_42 = arith.constant 9.99999974E-6 : f32
    %63 = arith.addf %62, %cst_42 : f32
    %cst_43 = arith.constant 1.000000e+00 : f32
    %64 = arith.divf %cst_43, %63 : f32
    %65 = vector.broadcast %64 : f32 to vector<8x12xf32>
    %66 = arith.mulf %58, %65 : vector<8x12xf32>
    %67 = vector.extract_strided_slice %18 {offsets = [40, 0], sizes = [8, 12], strides = [1, 1]} : vector<64x12xf32> to vector<8x12xf32>
    %68 = vector.shape_cast %67 : vector<8x12xf32> to vector<1x8x12xf32>
    %cst_44 = arith.constant dense<0.000000e+00> : vector<1xf32>
    %69 = vector.multi_reduction <add>, %68, %cst_44 [1, 2] : vector<1x8x12xf32> to vector<1xf32>
    %70 = vector.shape_cast %69 : vector<1xf32> to vector<1x1x1xf32>
    %71 = vector.extract %70[0, 0, 0] : f32 from vector<1x1x1xf32>
    %cst_45 = arith.constant 9.99999974E-6 : f32
    %72 = arith.addf %71, %cst_45 : f32
    %cst_46 = arith.constant 1.000000e+00 : f32
    %73 = arith.divf %cst_46, %72 : f32
    %74 = vector.broadcast %73 : f32 to vector<8x12xf32>
    %75 = arith.mulf %67, %74 : vector<8x12xf32>
    %76 = vector.extract_strided_slice %18 {offsets = [48, 0], sizes = [8, 12], strides = [1, 1]} : vector<64x12xf32> to vector<8x12xf32>
    %77 = vector.shape_cast %76 : vector<8x12xf32> to vector<1x8x12xf32>
    %cst_47 = arith.constant dense<0.000000e+00> : vector<1xf32>
    %78 = vector.multi_reduction <add>, %77, %cst_47 [1, 2] : vector<1x8x12xf32> to vector<1xf32>
    %79 = vector.shape_cast %78 : vector<1xf32> to vector<1x1x1xf32>
    %80 = vector.extract %79[0, 0, 0] : f32 from vector<1x1x1xf32>
    %cst_48 = arith.constant 9.99999974E-6 : f32
    %81 = arith.addf %80, %cst_48 : f32
    %cst_49 = arith.constant 1.000000e+00 : f32
    %82 = arith.divf %cst_49, %81 : f32
    %83 = vector.broadcast %82 : f32 to vector<8x12xf32>
    %84 = arith.mulf %76, %83 : vector<8x12xf32>
    %85 = vector.extract_strided_slice %18 {offsets = [56, 0], sizes = [8, 12], strides = [1, 1]} : vector<64x12xf32> to vector<8x12xf32>
    %86 = vector.shape_cast %85 : vector<8x12xf32> to vector<1x8x12xf32>
    %cst_50 = arith.constant dense<0.000000e+00> : vector<1xf32>
    %87 = vector.multi_reduction <add>, %86, %cst_50 [1, 2] : vector<1x8x12xf32> to vector<1xf32>
    %88 = vector.shape_cast %87 : vector<1xf32> to vector<1x1x1xf32>
    %89 = vector.extract %88[0, 0, 0] : f32 from vector<1x1x1xf32>
    %cst_51 = arith.constant 9.99999974E-6 : f32
    %90 = arith.addf %89, %cst_51 : f32
    %cst_52 = arith.constant 1.000000e+00 : f32
    %91 = arith.divf %cst_52, %90 : f32
    %92 = vector.broadcast %91 : f32 to vector<8x12xf32>
    %93 = arith.mulf %85, %92 : vector<8x12xf32>
    %cst_53 = arith.constant dense<0.000000e+00> : vector<64x44xf32>
    %94 = tpu.matmul %16, %0, %cst_53 {dimension_numbers = #tpu.dot_dimension_numbers<[1], [0], [0], [1], [0, 0, 1, 1], [], []>} : vector<64x12xf32>, vector<12x44xf32>, vector<64x44xf32> -> vector<64x44xf32>
    %95 = vector.broadcast %1 : vector<1x44xf32> to vector<64x44xf32>
    %96 = arith.addf %94, %95 : vector<64x44xf32>
    %cst_54 = arith.constant 0.000000e+00 : f32
    %97 = vector.broadcast %cst_54 : f32 to vector<64x44xf32>
    %98 = arith.maximumf %96, %97 : vector<64x44xf32>
    %cst_55 = arith.constant 0.000000e+00 : f32
    %99 = vector.broadcast %cst_55 : f32 to vector<64x44xf32>
    %100 = arith.subf %99, %98 : vector<64x44xf32>
    %101 = math.exp %100 : vector<64x44xf32>
    %102 = vector.extract_strided_slice %101 {offsets = [0, 0], sizes = [64, 32], strides = [1, 1]} : vector<64x44xf32> to vector<64x32xf32>
    %103 = vector.extract_strided_slice %101 {offsets = [0, 32], sizes = [64, 12], strides = [1, 1]} : vector<64x44xf32> to vector<64x12xf32>
    %cst_56 = arith.constant dense<0.000000e+00> : vector<64x140xf32>
    %104 = tpu.matmul %15, %5, %cst_56 {dimension_numbers = #tpu.dot_dimension_numbers<[1], [0], [0], [1], [0, 0, 1, 1], [], []>} : vector<64x12xf32>, vector<12x140xf32>, vector<64x140xf32> -> vector<64x140xf32>
    %105 = vector.extract_strided_slice %104 {offsets = [0, 0], sizes = [64, 128], strides = [1, 1]} : vector<64x140xf32> to vector<64x128xf32>
    %106 = vector.broadcast %7 : vector<1x128xf32> to vector<64x128xf32>
    %107 = arith.addf %105, %106 : vector<64x128xf32>
    %cst_57 = arith.constant dense<0.000000e+00> : vector<64x12xf32>
    %108 = tpu.matmul %103, %4, %cst_57 {dimension_numbers = #tpu.dot_dimension_numbers<[1], [0], [0], [1], [0, 0, 1, 1], [], []>} : vector<64x12xf32>, vector<12x12xf32>, vector<64x12xf32> -> vector<64x12xf32>
    %109 = vector.extract_strided_slice %104 {offsets = [0, 128], sizes = [64, 12], strides = [1, 1]} : vector<64x140xf32> to vector<64x12xf32>
    %110 = arith.addf %108, %109 : vector<64x12xf32>
    %c0_58 = arith.constant 0 : index
    %c0_59 = arith.constant 0 : index
    %111 = vector.load %arg13[%c0_58, %c0_59] : memref<1x12xf32, #tpu.memory_space<vmem>>, vector<1x12xf32>
    %112 = vector.broadcast %111 : vector<1x12xf32> to vector<64x12xf32>
    %113 = arith.addf %110, %112 : vector<64x12xf32>
    %cst_60 = arith.constant 1.000000e+00 : f32
    %114 = vector.broadcast %cst_60 : f32 to vector<64x12xf32>
    %115 = arith.subf %114, %113 : vector<64x12xf32>
    %cst_61 = arith.constant 0.000000e+00 : f32
    %116 = vector.broadcast %cst_61 : f32 to vector<8x32xf32>
    %cst_62 = arith.constant 0.000000e+00 : f32
    %117 = vector.broadcast %cst_62 : f32 to vector<8x32xf32>
    %cst_63 = arith.constant 0.000000e+00 : f32
    %118 = vector.broadcast %cst_63 : f32 to vector<8x12xf32>
    %119 = vector.extract_strided_slice %102 {offsets = [0, 0], sizes = [8, 32], strides = [1, 1]} : vector<64x32xf32> to vector<8x32xf32>
    %120 = arith.mulf %116, %119 : vector<8x32xf32>
    %cst_64 = arith.constant dense<0.000000e+00> : vector<8x140xf32>
    %121 = tpu.matmul %120, %2, %cst_64 {dimension_numbers = #tpu.dot_dimension_numbers<[1], [0], [0], [1], [0, 0, 1, 1], [], []>} : vector<8x32xf32>, vector<32x140xf32>, vector<8x140xf32> -> vector<8x140xf32>
    %122 = vector.extract_strided_slice %121 {offsets = [0, 0], sizes = [8, 128], strides = [1, 1]} : vector<8x140xf32> to vector<8x128xf32>
    %123 = vector.extract_strided_slice %121 {offsets = [0, 128], sizes = [8, 12], strides = [1, 1]} : vector<8x140xf32> to vector<8x12xf32>
    %124 = arith.addf %123, %10 : vector<8x12xf32>
    %125 = vector.extract_strided_slice %19 {offsets = [0, 0], sizes = [8, 12], strides = [1, 1]} : vector<64x12xf32> to vector<8x12xf32>
    %126 = vector.extract_strided_slice %21 {offsets = [0, 0], sizes = [8, 12], strides = [1, 1]} : vector<64x12xf32> to vector<8x12xf32>
    %127 = vector.extract_strided_slice %17 {offsets = [0, 0], sizes = [8, 12], strides = [1, 1]} : vector<64x12xf32> to vector<8x12xf32>
    %128 = vector.extract_strided_slice %113 {offsets = [0, 0], sizes = [8, 12], strides = [1, 1]} : vector<64x12xf32> to vector<8x12xf32>
    %129 = vector.extract_strided_slice %115 {offsets = [0, 0], sizes = [8, 12], strides = [1, 1]} : vector<64x12xf32> to vector<8x12xf32>
    %130 = arith.mulf %126, %124 : vector<8x12xf32>
    %131 = arith.addf %125, %130 : vector<8x12xf32>
    %cst_65 = arith.constant dense<0.000000e+00> : vector<8x12xf32>
    %132 = tpu.matmul %131, %3, %cst_65 {dimension_numbers = #tpu.dot_dimension_numbers<[1], [0], [0], [1], [0, 0, 1, 1], [], []>} : vector<8x12xf32>, vector<12x12xf32>, vector<8x12xf32> -> vector<8x12xf32>
    %133 = arith.addf %132, %13 : vector<8x12xf32>
    %134 = arith.mulf %128, %133 : vector<8x12xf32>
    %135 = arith.mulf %129, %124 : vector<8x12xf32>
    %136 = arith.addf %134, %135 : vector<8x12xf32>
    %137 = arith.mulf %126, %136 : vector<8x12xf32>
    %138 = arith.addf %125, %137 : vector<8x12xf32>
    %c0_66 = arith.constant 0 : index
    %c0_67 = arith.constant 0 : index
    %c0_68 = arith.constant 0 : index
    %139 = vector.load %arg17[%c0_66, %c0_67, %c0_68] : memref<8x8x12xf32, #tpu.memory_space<vmem>>, vector<1x8x12xf32>
    %140 = vector.shape_cast %139 : vector<1x8x12xf32> to vector<8x12xf32>
    %141 = vector.shape_cast %138 : vector<8x12xf32> to vector<1x8x12xf32>
    tpu.vector_store %arg17[%c0_66, %c0_67, %c0_68], %141 {strides = array<i32>} : memref<8x8x12xf32, #tpu.memory_space<vmem>>, vector<1x8x12xf32>,
    %142 = arith.subf %127, %124 : vector<8x12xf32>
    %143 = math.absf %142 : vector<8x12xf32>
    %144 = arith.subf %127, %133 : vector<8x12xf32>
    %145 = math.absf %144 : vector<8x12xf32>
    %146 = arith.addf %143, %145 : vector<8x12xf32>
    %147 = arith.subf %127, %136 : vector<8x12xf32>
    %148 = math.absf %147 : vector<8x12xf32>
    %149 = arith.addf %146, %148 : vector<8x12xf32>
    %150 = arith.mulf %149, %30 : vector<8x12xf32>
    %151 = arith.addf %118, %150 : vector<8x12xf32>
    %cst_69 = arith.constant dense<0.000000e+00> : vector<8x128xf32>
    %152 = tpu.matmul %138, %6, %cst_69 {dimension_numbers = #tpu.dot_dimension_numbers<[1], [0], [0], [1], [0, 0, 1, 1], [], []>} : vector<8x12xf32>, vector<12x128xf32>, vector<8x128xf32> -> vector<8x128xf32>
    %153 = vector.extract_strided_slice %107 {offsets = [0, 0], sizes = [8, 128], strides = [1, 1]} : vector<64x128xf32> to vector<8x128xf32>
    %154 = arith.addf %152, %153 : vector<8x128xf32>
    %155 = arith.addf %154, %122 : vector<8x128xf32>
    %156 = vector.extract_strided_slice %155 {offsets = [0, 0], sizes = [8, 96], strides = [1, 1]} : vector<8x128xf32> to vector<8x96xf32>
    %157 = arith.negf %156 : vector<8x96xf32>
    %158 = math.exp %157 : vector<8x96xf32>
    %cst_70 = arith.constant 1.000000e+00 : f32
    %159 = vector.broadcast %cst_70 : f32 to vector<8x96xf32>
    %160 = arith.addf %159, %158 : vector<8x96xf32>
    %161 = arith.divf %159, %160 : vector<8x96xf32>
    %162 = vector.extract_strided_slice %155 {offsets = [0, 96], sizes = [8, 32], strides = [1, 1]} : vector<8x128xf32> to vector<8x32xf32>
    %163 = math.tanh %162 : vector<8x32xf32>
    %164 = vector.extract_strided_slice %161 {offsets = [0, 0], sizes = [8, 32], strides = [1, 1]} : vector<8x96xf32> to vector<8x32xf32>
    %165 = vector.extract_strided_slice %161 {offsets = [0, 32], sizes = [8, 32], strides = [1, 1]} : vector<8x96xf32> to vector<8x32xf32>
    %166 = vector.extract_strided_slice %161 {offsets = [0, 64], sizes = [8, 32], strides = [1, 1]} : vector<8x96xf32> to vector<8x32xf32>
    %167 = arith.mulf %165, %117 : vector<8x32xf32>
    %168 = arith.mulf %164, %163 : vector<8x32xf32>
    %169 = arith.addf %167, %168 : vector<8x32xf32>
    %170 = math.tanh %169 : vector<8x32xf32>
    %171 = arith.mulf %166, %170 : vector<8x32xf32>
    %172 = vector.extract_strided_slice %102 {offsets = [8, 0], sizes = [8, 32], strides = [1, 1]} : vector<64x32xf32> to vector<8x32xf32>
    %173 = arith.mulf %171, %172 : vector<8x32xf32>
    %cst_71 = arith.constant dense<0.000000e+00> : vector<8x140xf32>
    %174 = tpu.matmul %173, %2, %cst_71 {dimension_numbers = #tpu.dot_dimension_numbers<[1], [0], [0], [1], [0, 0, 1, 1], [], []>} : vector<8x32xf32>, vector<32x140xf32>, vector<8x140xf32> -> vector<8x140xf32>
    %175 = vector.extract_strided_slice %174 {offsets = [0, 0], sizes = [8, 128], strides = [1, 1]} : vector<8x140xf32> to vector<8x128xf32>
    %176 = vector.extract_strided_slice %174 {offsets = [0, 128], sizes = [8, 12], strides = [1, 1]} : vector<8x140xf32> to vector<8x12xf32>
    %177 = arith.addf %176, %10 : vector<8x12xf32>
    %178 = vector.extract_strided_slice %19 {offsets = [8, 0], sizes = [8, 12], strides = [1, 1]} : vector<64x12xf32> to vector<8x12xf32>
    %179 = vector.extract_strided_slice %21 {offsets = [8, 0], sizes = [8, 12], strides = [1, 1]} : vector<64x12xf32> to vector<8x12xf32>
    %180 = vector.extract_strided_slice %17 {offsets = [8, 0], sizes = [8, 12], strides = [1, 1]} : vector<64x12xf32> to vector<8x12xf32>
    %181 = vector.extract_strided_slice %113 {offsets = [8, 0], sizes = [8, 12], strides = [1, 1]} : vector<64x12xf32> to vector<8x12xf32>
    %182 = vector.extract_strided_slice %115 {offsets = [8, 0], sizes = [8, 12], strides = [1, 1]} : vector<64x12xf32> to vector<8x12xf32>
    %183 = arith.mulf %179, %177 : vector<8x12xf32>
    %184 = arith.addf %178, %183 : vector<8x12xf32>
    %cst_72 = arith.constant dense<0.000000e+00> : vector<8x12xf32>
    %185 = tpu.matmul %184, %3, %cst_72 {dimension_numbers = #tpu.dot_dimension_numbers<[1], [0], [0], [1], [0, 0, 1, 1], [], []>} : vector<8x12xf32>, vector<12x12xf32>, vector<8x12xf32> -> vector<8x12xf32>
    %186 = arith.addf %185, %13 : vector<8x12xf32>
    %187 = arith.mulf %181, %186 : vector<8x12xf32>
    %188 = arith.mulf %182, %177 : vector<8x12xf32>
    %189 = arith.addf %187, %188 : vector<8x12xf32>
    %190 = arith.mulf %179, %189 : vector<8x12xf32>
    %191 = arith.addf %178, %190 : vector<8x12xf32>
    %c1 = arith.constant 1 : index
    %c0_73 = arith.constant 0 : index
    %c0_74 = arith.constant 0 : index
    %192 = vector.load %arg17[%c1, %c0_73, %c0_74] : memref<8x8x12xf32, #tpu.memory_space<vmem>>, vector<1x8x12xf32>
    %193 = vector.shape_cast %192 : vector<1x8x12xf32> to vector<8x12xf32>
    %194 = vector.shape_cast %191 : vector<8x12xf32> to vector<1x8x12xf32>
    tpu.vector_store %arg17[%c1, %c0_73, %c0_74], %194 {strides = array<i32>} : memref<8x8x12xf32, #tpu.memory_space<vmem>>, vector<1x8x12xf32>,
    %195 = arith.subf %180, %177 : vector<8x12xf32>
    %196 = math.absf %195 : vector<8x12xf32>
    %197 = arith.subf %180, %186 : vector<8x12xf32>
    %198 = math.absf %197 : vector<8x12xf32>
    %199 = arith.addf %196, %198 : vector<8x12xf32>
    %200 = arith.subf %180, %189 : vector<8x12xf32>
    %201 = math.absf %200 : vector<8x12xf32>
    %202 = arith.addf %199, %201 : vector<8x12xf32>
    %203 = arith.mulf %202, %39 : vector<8x12xf32>
    %204 = arith.addf %151, %203 : vector<8x12xf32>
    %cst_75 = arith.constant dense<0.000000e+00> : vector<8x128xf32>
    %205 = tpu.matmul %191, %6, %cst_75 {dimension_numbers = #tpu.dot_dimension_numbers<[1], [0], [0], [1], [0, 0, 1, 1], [], []>} : vector<8x12xf32>, vector<12x128xf32>, vector<8x128xf32> -> vector<8x128xf32>
    %206 = vector.extract_strided_slice %107 {offsets = [8, 0], sizes = [8, 128], strides = [1, 1]} : vector<64x128xf32> to vector<8x128xf32>
    %207 = arith.addf %205, %206 : vector<8x128xf32>
    %208 = arith.addf %207, %175 : vector<8x128xf32>
    %209 = vector.extract_strided_slice %208 {offsets = [0, 0], sizes = [8, 96], strides = [1, 1]} : vector<8x128xf32> to vector<8x96xf32>
    %210 = arith.negf %209 : vector<8x96xf32>
    %211 = math.exp %210 : vector<8x96xf32>
    %cst_76 = arith.constant 1.000000e+00 : f32
    %212 = vector.broadcast %cst_76 : f32 to vector<8x96xf32>
    %213 = arith.addf %212, %211 : vector<8x96xf32>
    %214 = arith.divf %212, %213 : vector<8x96xf32>
    %215 = vector.extract_strided_slice %208 {offsets = [0, 96], sizes = [8, 32], strides = [1, 1]} : vector<8x128xf32> to vector<8x32xf32>
    %216 = math.tanh %215 : vector<8x32xf32>
    %217 = vector.extract_strided_slice %214 {offsets = [0, 0], sizes = [8, 32], strides = [1, 1]} : vector<8x96xf32> to vector<8x32xf32>
    %218 = vector.extract_strided_slice %214 {offsets = [0, 32], sizes = [8, 32], strides = [1, 1]} : vector<8x96xf32> to vector<8x32xf32>
    %219 = vector.extract_strided_slice %214 {offsets = [0, 64], sizes = [8, 32], strides = [1, 1]} : vector<8x96xf32> to vector<8x32xf32>
    %220 = arith.mulf %218, %169 : vector<8x32xf32>
    %221 = arith.mulf %217, %216 : vector<8x32xf32>
    %222 = arith.addf %220, %221 : vector<8x32xf32>
    %223 = math.tanh %222 : vector<8x32xf32>
    %224 = arith.mulf %219, %223 : vector<8x32xf32>
    %225 = vector.extract_strided_slice %102 {offsets = [16, 0], sizes = [8, 32], strides = [1, 1]} : vector<64x32xf32> to vector<8x32xf32>
    %226 = arith.mulf %224, %225 : vector<8x32xf32>
    %cst_77 = arith.constant dense<0.000000e+00> : vector<8x140xf32>
    %227 = tpu.matmul %226, %2, %cst_77 {dimension_numbers = #tpu.dot_dimension_numbers<[1], [0], [0], [1], [0, 0, 1, 1], [], []>} : vector<8x32xf32>, vector<32x140xf32>, vector<8x140xf32> -> vector<8x140xf32>
    %228 = vector.extract_strided_slice %227 {offsets = [0, 0], sizes = [8, 128], strides = [1, 1]} : vector<8x140xf32> to vector<8x128xf32>
    %229 = vector.extract_strided_slice %227 {offsets = [0, 128], sizes = [8, 12], strides = [1, 1]} : vector<8x140xf32> to vector<8x12xf32>
    %230 = arith.addf %229, %10 : vector<8x12xf32>
    %231 = vector.extract_strided_slice %19 {offsets = [16, 0], sizes = [8, 12], strides = [1, 1]} : vector<64x12xf32> to vector<8x12xf32>
    %232 = vector.extract_strided_slice %21 {offsets = [16, 0], sizes = [8, 12], strides = [1, 1]} : vector<64x12xf32> to vector<8x12xf32>
    %233 = vector.extract_strided_slice %17 {offsets = [16, 0], sizes = [8, 12], strides = [1, 1]} : vector<64x12xf32> to vector<8x12xf32>
    %234 = vector.extract_strided_slice %113 {offsets = [16, 0], sizes = [8, 12], strides = [1, 1]} : vector<64x12xf32> to vector<8x12xf32>
    %235 = vector.extract_strided_slice %115 {offsets = [16, 0], sizes = [8, 12], strides = [1, 1]} : vector<64x12xf32> to vector<8x12xf32>
    %236 = arith.mulf %232, %230 : vector<8x12xf32>
    %237 = arith.addf %231, %236 : vector<8x12xf32>
    %cst_78 = arith.constant dense<0.000000e+00> : vector<8x12xf32>
    %238 = tpu.matmul %237, %3, %cst_78 {dimension_numbers = #tpu.dot_dimension_numbers<[1], [0], [0], [1], [0, 0, 1, 1], [], []>} : vector<8x12xf32>, vector<12x12xf32>, vector<8x12xf32> -> vector<8x12xf32>
    %239 = arith.addf %238, %13 : vector<8x12xf32>
    %240 = arith.mulf %234, %239 : vector<8x12xf32>
    %241 = arith.mulf %235, %230 : vector<8x12xf32>
    %242 = arith.addf %240, %241 : vector<8x12xf32>
    %243 = arith.mulf %232, %242 : vector<8x12xf32>
    %244 = arith.addf %231, %243 : vector<8x12xf32>
    %c2 = arith.constant 2 : index
    %c0_79 = arith.constant 0 : index
    %c0_80 = arith.constant 0 : index
    %245 = vector.load %arg17[%c2, %c0_79, %c0_80] : memref<8x8x12xf32, #tpu.memory_space<vmem>>, vector<1x8x12xf32>
    %246 = vector.shape_cast %245 : vector<1x8x12xf32> to vector<8x12xf32>
    %247 = vector.shape_cast %244 : vector<8x12xf32> to vector<1x8x12xf32>
    tpu.vector_store %arg17[%c2, %c0_79, %c0_80], %247 {strides = array<i32>} : memref<8x8x12xf32, #tpu.memory_space<vmem>>, vector<1x8x12xf32>,
    %248 = arith.subf %233, %230 : vector<8x12xf32>
    %249 = math.absf %248 : vector<8x12xf32>
    %250 = arith.subf %233, %239 : vector<8x12xf32>
    %251 = math.absf %250 : vector<8x12xf32>
    %252 = arith.addf %249, %251 : vector<8x12xf32>
    %253 = arith.subf %233, %242 : vector<8x12xf32>
    %254 = math.absf %253 : vector<8x12xf32>
    %255 = arith.addf %252, %254 : vector<8x12xf32>
    %256 = arith.mulf %255, %48 : vector<8x12xf32>
    %257 = arith.addf %204, %256 : vector<8x12xf32>
    %cst_81 = arith.constant dense<0.000000e+00> : vector<8x128xf32>
    %258 = tpu.matmul %244, %6, %cst_81 {dimension_numbers = #tpu.dot_dimension_numbers<[1], [0], [0], [1], [0, 0, 1, 1], [], []>} : vector<8x12xf32>, vector<12x128xf32>, vector<8x128xf32> -> vector<8x128xf32>
    %259 = vector.extract_strided_slice %107 {offsets = [16, 0], sizes = [8, 128], strides = [1, 1]} : vector<64x128xf32> to vector<8x128xf32>
    %260 = arith.addf %258, %259 : vector<8x128xf32>
    %261 = arith.addf %260, %228 : vector<8x128xf32>
    %262 = vector.extract_strided_slice %261 {offsets = [0, 0], sizes = [8, 96], strides = [1, 1]} : vector<8x128xf32> to vector<8x96xf32>
    %263 = arith.negf %262 : vector<8x96xf32>
    %264 = math.exp %263 : vector<8x96xf32>
    %cst_82 = arith.constant 1.000000e+00 : f32
    %265 = vector.broadcast %cst_82 : f32 to vector<8x96xf32>
    %266 = arith.addf %265, %264 : vector<8x96xf32>
    %267 = arith.divf %265, %266 : vector<8x96xf32>
    %268 = vector.extract_strided_slice %261 {offsets = [0, 96], sizes = [8, 32], strides = [1, 1]} : vector<8x128xf32> to vector<8x32xf32>
    %269 = math.tanh %268 : vector<8x32xf32>
    %270 = vector.extract_strided_slice %267 {offsets = [0, 0], sizes = [8, 32], strides = [1, 1]} : vector<8x96xf32> to vector<8x32xf32>
    %271 = vector.extract_strided_slice %267 {offsets = [0, 32], sizes = [8, 32], strides = [1, 1]} : vector<8x96xf32> to vector<8x32xf32>
    %272 = vector.extract_strided_slice %267 {offsets = [0, 64], sizes = [8, 32], strides = [1, 1]} : vector<8x96xf32> to vector<8x32xf32>
    %273 = arith.mulf %271, %222 : vector<8x32xf32>
    %274 = arith.mulf %270, %269 : vector<8x32xf32>
    %275 = arith.addf %273, %274 : vector<8x32xf32>
    %276 = math.tanh %275 : vector<8x32xf32>
    %277 = arith.mulf %272, %276 : vector<8x32xf32>
    %278 = vector.extract_strided_slice %102 {offsets = [24, 0], sizes = [8, 32], strides = [1, 1]} : vector<64x32xf32> to vector<8x32xf32>
    %279 = arith.mulf %277, %278 : vector<8x32xf32>
    %cst_83 = arith.constant dense<0.000000e+00> : vector<8x140xf32>
    %280 = tpu.matmul %279, %2, %cst_83 {dimension_numbers = #tpu.dot_dimension_numbers<[1], [0], [0], [1], [0, 0, 1, 1], [], []>} : vector<8x32xf32>, vector<32x140xf32>, vector<8x140xf32> -> vector<8x140xf32>
    %281 = vector.extract_strided_slice %280 {offsets = [0, 0], sizes = [8, 128], strides = [1, 1]} : vector<8x140xf32> to vector<8x128xf32>
    %282 = vector.extract_strided_slice %280 {offsets = [0, 128], sizes = [8, 12], strides = [1, 1]} : vector<8x140xf32> to vector<8x12xf32>
    %283 = arith.addf %282, %10 : vector<8x12xf32>
    %284 = vector.extract_strided_slice %19 {offsets = [24, 0], sizes = [8, 12], strides = [1, 1]} : vector<64x12xf32> to vector<8x12xf32>
    %285 = vector.extract_strided_slice %21 {offsets = [24, 0], sizes = [8, 12], strides = [1, 1]} : vector<64x12xf32> to vector<8x12xf32>
    %286 = vector.extract_strided_slice %17 {offsets = [24, 0], sizes = [8, 12], strides = [1, 1]} : vector<64x12xf32> to vector<8x12xf32>
    %287 = vector.extract_strided_slice %113 {offsets = [24, 0], sizes = [8, 12], strides = [1, 1]} : vector<64x12xf32> to vector<8x12xf32>
    %288 = vector.extract_strided_slice %115 {offsets = [24, 0], sizes = [8, 12], strides = [1, 1]} : vector<64x12xf32> to vector<8x12xf32>
    %289 = arith.mulf %285, %283 : vector<8x12xf32>
    %290 = arith.addf %284, %289 : vector<8x12xf32>
    %cst_84 = arith.constant dense<0.000000e+00> : vector<8x12xf32>
    %291 = tpu.matmul %290, %3, %cst_84 {dimension_numbers = #tpu.dot_dimension_numbers<[1], [0], [0], [1], [0, 0, 1, 1], [], []>} : vector<8x12xf32>, vector<12x12xf32>, vector<8x12xf32> -> vector<8x12xf32>
    %292 = arith.addf %291, %13 : vector<8x12xf32>
    %293 = arith.mulf %287, %292 : vector<8x12xf32>
    %294 = arith.mulf %288, %283 : vector<8x12xf32>
    %295 = arith.addf %293, %294 : vector<8x12xf32>
    %296 = arith.mulf %285, %295 : vector<8x12xf32>
    %297 = arith.addf %284, %296 : vector<8x12xf32>
    %c3 = arith.constant 3 : index
    %c0_85 = arith.constant 0 : index
    %c0_86 = arith.constant 0 : index
    %298 = vector.load %arg17[%c3, %c0_85, %c0_86] : memref<8x8x12xf32, #tpu.memory_space<vmem>>, vector<1x8x12xf32>
    %299 = vector.shape_cast %298 : vector<1x8x12xf32> to vector<8x12xf32>
    %300 = vector.shape_cast %297 : vector<8x12xf32> to vector<1x8x12xf32>
    tpu.vector_store %arg17[%c3, %c0_85, %c0_86], %300 {strides = array<i32>} : memref<8x8x12xf32, #tpu.memory_space<vmem>>, vector<1x8x12xf32>,
    %301 = arith.subf %286, %283 : vector<8x12xf32>
    %302 = math.absf %301 : vector<8x12xf32>
    %303 = arith.subf %286, %292 : vector<8x12xf32>
    %304 = math.absf %303 : vector<8x12xf32>
    %305 = arith.addf %302, %304 : vector<8x12xf32>
    %306 = arith.subf %286, %295 : vector<8x12xf32>
    %307 = math.absf %306 : vector<8x12xf32>
    %308 = arith.addf %305, %307 : vector<8x12xf32>
    %309 = arith.mulf %308, %57 : vector<8x12xf32>
    %310 = arith.addf %257, %309 : vector<8x12xf32>
    %cst_87 = arith.constant dense<0.000000e+00> : vector<8x128xf32>
    %311 = tpu.matmul %297, %6, %cst_87 {dimension_numbers = #tpu.dot_dimension_numbers<[1], [0], [0], [1], [0, 0, 1, 1], [], []>} : vector<8x12xf32>, vector<12x128xf32>, vector<8x128xf32> -> vector<8x128xf32>
    %312 = vector.extract_strided_slice %107 {offsets = [24, 0], sizes = [8, 128], strides = [1, 1]} : vector<64x128xf32> to vector<8x128xf32>
    %313 = arith.addf %311, %312 : vector<8x128xf32>
    %314 = arith.addf %313, %281 : vector<8x128xf32>
    %315 = vector.extract_strided_slice %314 {offsets = [0, 0], sizes = [8, 96], strides = [1, 1]} : vector<8x128xf32> to vector<8x96xf32>
    %316 = arith.negf %315 : vector<8x96xf32>
    %317 = math.exp %316 : vector<8x96xf32>
    %cst_88 = arith.constant 1.000000e+00 : f32
    %318 = vector.broadcast %cst_88 : f32 to vector<8x96xf32>
    %319 = arith.addf %318, %317 : vector<8x96xf32>
    %320 = arith.divf %318, %319 : vector<8x96xf32>
    %321 = vector.extract_strided_slice %314 {offsets = [0, 96], sizes = [8, 32], strides = [1, 1]} : vector<8x128xf32> to vector<8x32xf32>
    %322 = math.tanh %321 : vector<8x32xf32>
    %323 = vector.extract_strided_slice %320 {offsets = [0, 0], sizes = [8, 32], strides = [1, 1]} : vector<8x96xf32> to vector<8x32xf32>
    %324 = vector.extract_strided_slice %320 {offsets = [0, 32], sizes = [8, 32], strides = [1, 1]} : vector<8x96xf32> to vector<8x32xf32>
    %325 = vector.extract_strided_slice %320 {offsets = [0, 64], sizes = [8, 32], strides = [1, 1]} : vector<8x96xf32> to vector<8x32xf32>
    %326 = arith.mulf %324, %275 : vector<8x32xf32>
    %327 = arith.mulf %323, %322 : vector<8x32xf32>
    %328 = arith.addf %326, %327 : vector<8x32xf32>
    %329 = math.tanh %328 : vector<8x32xf32>
    %330 = arith.mulf %325, %329 : vector<8x32xf32>
    %331 = vector.extract_strided_slice %102 {offsets = [32, 0], sizes = [8, 32], strides = [1, 1]} : vector<64x32xf32> to vector<8x32xf32>
    %332 = arith.mulf %330, %331 : vector<8x32xf32>
    %cst_89 = arith.constant dense<0.000000e+00> : vector<8x140xf32>
    %333 = tpu.matmul %332, %2, %cst_89 {dimension_numbers = #tpu.dot_dimension_numbers<[1], [0], [0], [1], [0, 0, 1, 1], [], []>} : vector<8x32xf32>, vector<32x140xf32>, vector<8x140xf32> -> vector<8x140xf32>
    %334 = vector.extract_strided_slice %333 {offsets = [0, 0], sizes = [8, 128], strides = [1, 1]} : vector<8x140xf32> to vector<8x128xf32>
    %335 = vector.extract_strided_slice %333 {offsets = [0, 128], sizes = [8, 12], strides = [1, 1]} : vector<8x140xf32> to vector<8x12xf32>
    %336 = arith.addf %335, %10 : vector<8x12xf32>
    %337 = vector.extract_strided_slice %19 {offsets = [32, 0], sizes = [8, 12], strides = [1, 1]} : vector<64x12xf32> to vector<8x12xf32>
    %338 = vector.extract_strided_slice %21 {offsets = [32, 0], sizes = [8, 12], strides = [1, 1]} : vector<64x12xf32> to vector<8x12xf32>
    %339 = vector.extract_strided_slice %17 {offsets = [32, 0], sizes = [8, 12], strides = [1, 1]} : vector<64x12xf32> to vector<8x12xf32>
    %340 = vector.extract_strided_slice %113 {offsets = [32, 0], sizes = [8, 12], strides = [1, 1]} : vector<64x12xf32> to vector<8x12xf32>
    %341 = vector.extract_strided_slice %115 {offsets = [32, 0], sizes = [8, 12], strides = [1, 1]} : vector<64x12xf32> to vector<8x12xf32>
    %342 = arith.mulf %338, %336 : vector<8x12xf32>
    %343 = arith.addf %337, %342 : vector<8x12xf32>
    %cst_90 = arith.constant dense<0.000000e+00> : vector<8x12xf32>
    %344 = tpu.matmul %343, %3, %cst_90 {dimension_numbers = #tpu.dot_dimension_numbers<[1], [0], [0], [1], [0, 0, 1, 1], [], []>} : vector<8x12xf32>, vector<12x12xf32>, vector<8x12xf32> -> vector<8x12xf32>
    %345 = arith.addf %344, %13 : vector<8x12xf32>
    %346 = arith.mulf %340, %345 : vector<8x12xf32>
    %347 = arith.mulf %341, %336 : vector<8x12xf32>
    %348 = arith.addf %346, %347 : vector<8x12xf32>
    %349 = arith.mulf %338, %348 : vector<8x12xf32>
    %350 = arith.addf %337, %349 : vector<8x12xf32>
    %c4 = arith.constant 4 : index
    %c0_91 = arith.constant 0 : index
    %c0_92 = arith.constant 0 : index
    %351 = vector.load %arg17[%c4, %c0_91, %c0_92] : memref<8x8x12xf32, #tpu.memory_space<vmem>>, vector<1x8x12xf32>
    %352 = vector.shape_cast %351 : vector<1x8x12xf32> to vector<8x12xf32>
    %353 = vector.shape_cast %350 : vector<8x12xf32> to vector<1x8x12xf32>
    tpu.vector_store %arg17[%c4, %c0_91, %c0_92], %353 {strides = array<i32>} : memref<8x8x12xf32, #tpu.memory_space<vmem>>, vector<1x8x12xf32>,
    %354 = arith.subf %339, %336 : vector<8x12xf32>
    %355 = math.absf %354 : vector<8x12xf32>
    %356 = arith.subf %339, %345 : vector<8x12xf32>
    %357 = math.absf %356 : vector<8x12xf32>
    %358 = arith.addf %355, %357 : vector<8x12xf32>
    %359 = arith.subf %339, %348 : vector<8x12xf32>
    %360 = math.absf %359 : vector<8x12xf32>
    %361 = arith.addf %358, %360 : vector<8x12xf32>
    %362 = arith.mulf %361, %66 : vector<8x12xf32>
    %363 = arith.addf %310, %362 : vector<8x12xf32>
    %cst_93 = arith.constant dense<0.000000e+00> : vector<8x128xf32>
    %364 = tpu.matmul %350, %6, %cst_93 {dimension_numbers = #tpu.dot_dimension_numbers<[1], [0], [0], [1], [0, 0, 1, 1], [], []>} : vector<8x12xf32>, vector<12x128xf32>, vector<8x128xf32> -> vector<8x128xf32>
    %365 = vector.extract_strided_slice %107 {offsets = [32, 0], sizes = [8, 128], strides = [1, 1]} : vector<64x128xf32> to vector<8x128xf32>
    %366 = arith.addf %364, %365 : vector<8x128xf32>
    %367 = arith.addf %366, %334 : vector<8x128xf32>
    %368 = vector.extract_strided_slice %367 {offsets = [0, 0], sizes = [8, 96], strides = [1, 1]} : vector<8x128xf32> to vector<8x96xf32>
    %369 = arith.negf %368 : vector<8x96xf32>
    %370 = math.exp %369 : vector<8x96xf32>
    %cst_94 = arith.constant 1.000000e+00 : f32
    %371 = vector.broadcast %cst_94 : f32 to vector<8x96xf32>
    %372 = arith.addf %371, %370 : vector<8x96xf32>
    %373 = arith.divf %371, %372 : vector<8x96xf32>
    %374 = vector.extract_strided_slice %367 {offsets = [0, 96], sizes = [8, 32], strides = [1, 1]} : vector<8x128xf32> to vector<8x32xf32>
    %375 = math.tanh %374 : vector<8x32xf32>
    %376 = vector.extract_strided_slice %373 {offsets = [0, 0], sizes = [8, 32], strides = [1, 1]} : vector<8x96xf32> to vector<8x32xf32>
    %377 = vector.extract_strided_slice %373 {offsets = [0, 32], sizes = [8, 32], strides = [1, 1]} : vector<8x96xf32> to vector<8x32xf32>
    %378 = vector.extract_strided_slice %373 {offsets = [0, 64], sizes = [8, 32], strides = [1, 1]} : vector<8x96xf32> to vector<8x32xf32>
    %379 = arith.mulf %377, %328 : vector<8x32xf32>
    %380 = arith.mulf %376, %375 : vector<8x32xf32>
    %381 = arith.addf %379, %380 : vector<8x32xf32>
    %382 = math.tanh %381 : vector<8x32xf32>
    %383 = arith.mulf %378, %382 : vector<8x32xf32>
    %384 = vector.extract_strided_slice %102 {offsets = [40, 0], sizes = [8, 32], strides = [1, 1]} : vector<64x32xf32> to vector<8x32xf32>
    %385 = arith.mulf %383, %384 : vector<8x32xf32>
    %cst_95 = arith.constant dense<0.000000e+00> : vector<8x140xf32>
    %386 = tpu.matmul %385, %2, %cst_95 {dimension_numbers = #tpu.dot_dimension_numbers<[1], [0], [0], [1], [0, 0, 1, 1], [], []>} : vector<8x32xf32>, vector<32x140xf32>, vector<8x140xf32> -> vector<8x140xf32>
    %387 = vector.extract_strided_slice %386 {offsets = [0, 0], sizes = [8, 128], strides = [1, 1]} : vector<8x140xf32> to vector<8x128xf32>
    %388 = vector.extract_strided_slice %386 {offsets = [0, 128], sizes = [8, 12], strides = [1, 1]} : vector<8x140xf32> to vector<8x12xf32>
    %389 = arith.addf %388, %10 : vector<8x12xf32>
    %390 = vector.extract_strided_slice %19 {offsets = [40, 0], sizes = [8, 12], strides = [1, 1]} : vector<64x12xf32> to vector<8x12xf32>
    %391 = vector.extract_strided_slice %21 {offsets = [40, 0], sizes = [8, 12], strides = [1, 1]} : vector<64x12xf32> to vector<8x12xf32>
    %392 = vector.extract_strided_slice %17 {offsets = [40, 0], sizes = [8, 12], strides = [1, 1]} : vector<64x12xf32> to vector<8x12xf32>
    %393 = vector.extract_strided_slice %113 {offsets = [40, 0], sizes = [8, 12], strides = [1, 1]} : vector<64x12xf32> to vector<8x12xf32>
    %394 = vector.extract_strided_slice %115 {offsets = [40, 0], sizes = [8, 12], strides = [1, 1]} : vector<64x12xf32> to vector<8x12xf32>
    %395 = arith.mulf %391, %389 : vector<8x12xf32>
    %396 = arith.addf %390, %395 : vector<8x12xf32>
    %cst_96 = arith.constant dense<0.000000e+00> : vector<8x12xf32>
    %397 = tpu.matmul %396, %3, %cst_96 {dimension_numbers = #tpu.dot_dimension_numbers<[1], [0], [0], [1], [0, 0, 1, 1], [], []>} : vector<8x12xf32>, vector<12x12xf32>, vector<8x12xf32> -> vector<8x12xf32>
    %398 = arith.addf %397, %13 : vector<8x12xf32>
    %399 = arith.mulf %393, %398 : vector<8x12xf32>
    %400 = arith.mulf %394, %389 : vector<8x12xf32>
    %401 = arith.addf %399, %400 : vector<8x12xf32>
    %402 = arith.mulf %391, %401 : vector<8x12xf32>
    %403 = arith.addf %390, %402 : vector<8x12xf32>
    %c5 = arith.constant 5 : index
    %c0_97 = arith.constant 0 : index
    %c0_98 = arith.constant 0 : index
    %404 = vector.load %arg17[%c5, %c0_97, %c0_98] : memref<8x8x12xf32, #tpu.memory_space<vmem>>, vector<1x8x12xf32>
    %405 = vector.shape_cast %404 : vector<1x8x12xf32> to vector<8x12xf32>
    %406 = vector.shape_cast %403 : vector<8x12xf32> to vector<1x8x12xf32>
    tpu.vector_store %arg17[%c5, %c0_97, %c0_98], %406 {strides = array<i32>} : memref<8x8x12xf32, #tpu.memory_space<vmem>>, vector<1x8x12xf32>,
    %407 = arith.subf %392, %389 : vector<8x12xf32>
    %408 = math.absf %407 : vector<8x12xf32>
    %409 = arith.subf %392, %398 : vector<8x12xf32>
    %410 = math.absf %409 : vector<8x12xf32>
    %411 = arith.addf %408, %410 : vector<8x12xf32>
    %412 = arith.subf %392, %401 : vector<8x12xf32>
    %413 = math.absf %412 : vector<8x12xf32>
    %414 = arith.addf %411, %413 : vector<8x12xf32>
    %415 = arith.mulf %414, %75 : vector<8x12xf32>
    %416 = arith.addf %363, %415 : vector<8x12xf32>
    %cst_99 = arith.constant dense<0.000000e+00> : vector<8x128xf32>
    %417 = tpu.matmul %403, %6, %cst_99 {dimension_numbers = #tpu.dot_dimension_numbers<[1], [0], [0], [1], [0, 0, 1, 1], [], []>} : vector<8x12xf32>, vector<12x128xf32>, vector<8x128xf32> -> vector<8x128xf32>
    %418 = vector.extract_strided_slice %107 {offsets = [40, 0], sizes = [8, 128], strides = [1, 1]} : vector<64x128xf32> to vector<8x128xf32>
    %419 = arith.addf %417, %418 : vector<8x128xf32>
    %420 = arith.addf %419, %387 : vector<8x128xf32>
    %421 = vector.extract_strided_slice %420 {offsets = [0, 0], sizes = [8, 96], strides = [1, 1]} : vector<8x128xf32> to vector<8x96xf32>
    %422 = arith.negf %421 : vector<8x96xf32>
    %423 = math.exp %422 : vector<8x96xf32>
    %cst_100 = arith.constant 1.000000e+00 : f32
    %424 = vector.broadcast %cst_100 : f32 to vector<8x96xf32>
    %425 = arith.addf %424, %423 : vector<8x96xf32>
    %426 = arith.divf %424, %425 : vector<8x96xf32>
    %427 = vector.extract_strided_slice %420 {offsets = [0, 96], sizes = [8, 32], strides = [1, 1]} : vector<8x128xf32> to vector<8x32xf32>
    %428 = math.tanh %427 : vector<8x32xf32>
    %429 = vector.extract_strided_slice %426 {offsets = [0, 0], sizes = [8, 32], strides = [1, 1]} : vector<8x96xf32> to vector<8x32xf32>
    %430 = vector.extract_strided_slice %426 {offsets = [0, 32], sizes = [8, 32], strides = [1, 1]} : vector<8x96xf32> to vector<8x32xf32>
    %431 = vector.extract_strided_slice %426 {offsets = [0, 64], sizes = [8, 32], strides = [1, 1]} : vector<8x96xf32> to vector<8x32xf32>
    %432 = arith.mulf %430, %381 : vector<8x32xf32>
    %433 = arith.mulf %429, %428 : vector<8x32xf32>
    %434 = arith.addf %432, %433 : vector<8x32xf32>
    %435 = math.tanh %434 : vector<8x32xf32>
    %436 = arith.mulf %431, %435 : vector<8x32xf32>
    %437 = vector.extract_strided_slice %102 {offsets = [48, 0], sizes = [8, 32], strides = [1, 1]} : vector<64x32xf32> to vector<8x32xf32>
    %438 = arith.mulf %436, %437 : vector<8x32xf32>
    %cst_101 = arith.constant dense<0.000000e+00> : vector<8x140xf32>
    %439 = tpu.matmul %438, %2, %cst_101 {dimension_numbers = #tpu.dot_dimension_numbers<[1], [0], [0], [1], [0, 0, 1, 1], [], []>} : vector<8x32xf32>, vector<32x140xf32>, vector<8x140xf32> -> vector<8x140xf32>
    %440 = vector.extract_strided_slice %439 {offsets = [0, 0], sizes = [8, 128], strides = [1, 1]} : vector<8x140xf32> to vector<8x128xf32>
    %441 = vector.extract_strided_slice %439 {offsets = [0, 128], sizes = [8, 12], strides = [1, 1]} : vector<8x140xf32> to vector<8x12xf32>
    %442 = arith.addf %441, %10 : vector<8x12xf32>
    %443 = vector.extract_strided_slice %19 {offsets = [48, 0], sizes = [8, 12], strides = [1, 1]} : vector<64x12xf32> to vector<8x12xf32>
    %444 = vector.extract_strided_slice %21 {offsets = [48, 0], sizes = [8, 12], strides = [1, 1]} : vector<64x12xf32> to vector<8x12xf32>
    %445 = vector.extract_strided_slice %17 {offsets = [48, 0], sizes = [8, 12], strides = [1, 1]} : vector<64x12xf32> to vector<8x12xf32>
    %446 = vector.extract_strided_slice %113 {offsets = [48, 0], sizes = [8, 12], strides = [1, 1]} : vector<64x12xf32> to vector<8x12xf32>
    %447 = vector.extract_strided_slice %115 {offsets = [48, 0], sizes = [8, 12], strides = [1, 1]} : vector<64x12xf32> to vector<8x12xf32>
    %448 = arith.mulf %444, %442 : vector<8x12xf32>
    %449 = arith.addf %443, %448 : vector<8x12xf32>
    %cst_102 = arith.constant dense<0.000000e+00> : vector<8x12xf32>
    %450 = tpu.matmul %449, %3, %cst_102 {dimension_numbers = #tpu.dot_dimension_numbers<[1], [0], [0], [1], [0, 0, 1, 1], [], []>} : vector<8x12xf32>, vector<12x12xf32>, vector<8x12xf32> -> vector<8x12xf32>
    %451 = arith.addf %450, %13 : vector<8x12xf32>
    %452 = arith.mulf %446, %451 : vector<8x12xf32>
    %453 = arith.mulf %447, %442 : vector<8x12xf32>
    %454 = arith.addf %452, %453 : vector<8x12xf32>
    %455 = arith.mulf %444, %454 : vector<8x12xf32>
    %456 = arith.addf %443, %455 : vector<8x12xf32>
    %c6 = arith.constant 6 : index
    %c0_103 = arith.constant 0 : index
    %c0_104 = arith.constant 0 : index
    %457 = vector.load %arg17[%c6, %c0_103, %c0_104] : memref<8x8x12xf32, #tpu.memory_space<vmem>>, vector<1x8x12xf32>
    %458 = vector.shape_cast %457 : vector<1x8x12xf32> to vector<8x12xf32>
    %459 = vector.shape_cast %456 : vector<8x12xf32> to vector<1x8x12xf32>
    tpu.vector_store %arg17[%c6, %c0_103, %c0_104], %459 {strides = array<i32>} : memref<8x8x12xf32, #tpu.memory_space<vmem>>, vector<1x8x12xf32>,
    %460 = arith.subf %445, %442 : vector<8x12xf32>
    %461 = math.absf %460 : vector<8x12xf32>
    %462 = arith.subf %445, %451 : vector<8x12xf32>
    %463 = math.absf %462 : vector<8x12xf32>
    %464 = arith.addf %461, %463 : vector<8x12xf32>
    %465 = arith.subf %445, %454 : vector<8x12xf32>
    %466 = math.absf %465 : vector<8x12xf32>
    %467 = arith.addf %464, %466 : vector<8x12xf32>
    %468 = arith.mulf %467, %84 : vector<8x12xf32>
    %469 = arith.addf %416, %468 : vector<8x12xf32>
    %cst_105 = arith.constant dense<0.000000e+00> : vector<8x128xf32>
    %470 = tpu.matmul %456, %6, %cst_105 {dimension_numbers = #tpu.dot_dimension_numbers<[1], [0], [0], [1], [0, 0, 1, 1], [], []>} : vector<8x12xf32>, vector<12x128xf32>, vector<8x128xf32> -> vector<8x128xf32>
    %471 = vector.extract_strided_slice %107 {offsets = [48, 0], sizes = [8, 128], strides = [1, 1]} : vector<64x128xf32> to vector<8x128xf32>
    %472 = arith.addf %470, %471 : vector<8x128xf32>
    %473 = arith.addf %472, %440 : vector<8x128xf32>
    %474 = vector.extract_strided_slice %473 {offsets = [0, 0], sizes = [8, 96], strides = [1, 1]} : vector<8x128xf32> to vector<8x96xf32>
    %475 = arith.negf %474 : vector<8x96xf32>
    %476 = math.exp %475 : vector<8x96xf32>
    %cst_106 = arith.constant 1.000000e+00 : f32
    %477 = vector.broadcast %cst_106 : f32 to vector<8x96xf32>
    %478 = arith.addf %477, %476 : vector<8x96xf32>
    %479 = arith.divf %477, %478 : vector<8x96xf32>
    %480 = vector.extract_strided_slice %473 {offsets = [0, 96], sizes = [8, 32], strides = [1, 1]} : vector<8x128xf32> to vector<8x32xf32>
    %481 = math.tanh %480 : vector<8x32xf32>
    %482 = vector.extract_strided_slice %479 {offsets = [0, 0], sizes = [8, 32], strides = [1, 1]} : vector<8x96xf32> to vector<8x32xf32>
    %483 = vector.extract_strided_slice %479 {offsets = [0, 32], sizes = [8, 32], strides = [1, 1]} : vector<8x96xf32> to vector<8x32xf32>
    %484 = vector.extract_strided_slice %479 {offsets = [0, 64], sizes = [8, 32], strides = [1, 1]} : vector<8x96xf32> to vector<8x32xf32>
    %485 = arith.mulf %483, %434 : vector<8x32xf32>
    %486 = arith.mulf %482, %481 : vector<8x32xf32>
    %487 = arith.addf %485, %486 : vector<8x32xf32>
    %488 = math.tanh %487 : vector<8x32xf32>
    %489 = arith.mulf %484, %488 : vector<8x32xf32>
    %490 = vector.extract_strided_slice %102 {offsets = [56, 0], sizes = [8, 32], strides = [1, 1]} : vector<64x32xf32> to vector<8x32xf32>
    %491 = arith.mulf %489, %490 : vector<8x32xf32>
    %cst_107 = arith.constant dense<0.000000e+00> : vector<8x140xf32>
    %492 = tpu.matmul %491, %2, %cst_107 {dimension_numbers = #tpu.dot_dimension_numbers<[1], [0], [0], [1], [0, 0, 1, 1], [], []>} : vector<8x32xf32>, vector<32x140xf32>, vector<8x140xf32> -> vector<8x140xf32>
    %493 = vector.extract_strided_slice %492 {offsets = [0, 128], sizes = [8, 12], strides = [1, 1]} : vector<8x140xf32> to vector<8x12xf32>
    %494 = arith.addf %493, %10 : vector<8x12xf32>
    %495 = vector.extract_strided_slice %19 {offsets = [56, 0], sizes = [8, 12], strides = [1, 1]} : vector<64x12xf32> to vector<8x12xf32>
    %496 = vector.extract_strided_slice %21 {offsets = [56, 0], sizes = [8, 12], strides = [1, 1]} : vector<64x12xf32> to vector<8x12xf32>
    %497 = vector.extract_strided_slice %17 {offsets = [56, 0], sizes = [8, 12], strides = [1, 1]} : vector<64x12xf32> to vector<8x12xf32>
    %498 = vector.extract_strided_slice %113 {offsets = [56, 0], sizes = [8, 12], strides = [1, 1]} : vector<64x12xf32> to vector<8x12xf32>
    %499 = vector.extract_strided_slice %115 {offsets = [56, 0], sizes = [8, 12], strides = [1, 1]} : vector<64x12xf32> to vector<8x12xf32>
    %500 = arith.mulf %496, %494 : vector<8x12xf32>
    %501 = arith.addf %495, %500 : vector<8x12xf32>
    %cst_108 = arith.constant dense<0.000000e+00> : vector<8x12xf32>
    %502 = tpu.matmul %501, %3, %cst_108 {dimension_numbers = #tpu.dot_dimension_numbers<[1], [0], [0], [1], [0, 0, 1, 1], [], []>} : vector<8x12xf32>, vector<12x12xf32>, vector<8x12xf32> -> vector<8x12xf32>
    %503 = arith.addf %502, %13 : vector<8x12xf32>
    %504 = arith.mulf %498, %503 : vector<8x12xf32>
    %505 = arith.mulf %499, %494 : vector<8x12xf32>
    %506 = arith.addf %504, %505 : vector<8x12xf32>
    %507 = arith.mulf %496, %506 : vector<8x12xf32>
    %508 = arith.addf %495, %507 : vector<8x12xf32>
    %c7 = arith.constant 7 : index
    %c0_109 = arith.constant 0 : index
    %c0_110 = arith.constant 0 : index
    %509 = vector.load %arg17[%c7, %c0_109, %c0_110] : memref<8x8x12xf32, #tpu.memory_space<vmem>>, vector<1x8x12xf32>
    %510 = vector.shape_cast %509 : vector<1x8x12xf32> to vector<8x12xf32>
    %511 = vector.shape_cast %508 : vector<8x12xf32> to vector<1x8x12xf32>
    tpu.vector_store %arg17[%c7, %c0_109, %c0_110], %511 {strides = array<i32>} : memref<8x8x12xf32, #tpu.memory_space<vmem>>, vector<1x8x12xf32>,
    %512 = arith.subf %497, %494 : vector<8x12xf32>
    %513 = math.absf %512 : vector<8x12xf32>
    %514 = arith.subf %497, %503 : vector<8x12xf32>
    %515 = math.absf %514 : vector<8x12xf32>
    %516 = arith.addf %513, %515 : vector<8x12xf32>
    %517 = arith.subf %497, %506 : vector<8x12xf32>
    %518 = math.absf %517 : vector<8x12xf32>
    %519 = arith.addf %516, %518 : vector<8x12xf32>
    %520 = arith.mulf %519, %93 : vector<8x12xf32>
    %521 = arith.addf %469, %520 : vector<8x12xf32>
    %522 = vector.shape_cast %521 : vector<8x12xf32> to vector<1x8x12xf32>
    %cst_111 = arith.constant dense<0.000000e+00> : vector<1xf32>
    %523 = vector.multi_reduction <add>, %522, %cst_111 [1, 2] : vector<1x8x12xf32> to vector<1xf32>
    %524 = vector.shape_cast %523 : vector<1xf32> to vector<1x1x1xf32>
    %525 = vector.extract %524[0, 0, 0] : f32 from vector<1x1x1xf32>
    %cst_112 = arith.constant 0.000000e+00 : f32
    %526 = vector.broadcast %cst_112 : f32 to vector<1x1xf32>
    %527 = vector.broadcast %525 : f32 to vector<1x1xf32>
    %528 = arith.addf %527, %526 : vector<1x1xf32>
    %c0_113 = arith.constant 0 : index
    %c0_114 = arith.constant 0 : index
    %529 = vector.load %arg18[%c0_113, %c0_114] : memref<1x1xf32, #tpu.memory_space<vmem>>, vector<1x1xf32>
    tpu.vector_store %arg18[%c0_113, %c0_114], %528 {strides = array<i32>} : memref<1x1xf32, #tpu.memory_space<vmem>>, vector<1x1xf32>,
    return
  }
  func.func @transform_0(%arg0: i32) -> (i32, i32) {
    %c0_i32 = arith.constant 0 : i32
    %c0_i32_0 = arith.constant 0 : i32
    %c0_i32_1 = arith.constant 0 : i32
    return %c0_i32, %c0_i32_0 : i32, i32
  }
  func.func @transform_1(%arg0: i32) -> (i32, i32) {
    %c0_i32 = arith.constant 0 : i32
    %c0_i32_0 = arith.constant 0 : i32
    %c0_i32_1 = arith.constant 0 : i32
    return %c0_i32, %c0_i32_0 : i32, i32
  }
  func.func @transform_2(%arg0: i32) -> (i32, i32) {
    %c0_i32 = arith.constant 0 : i32
    %c0_i32_0 = arith.constant 0 : i32
    %c0_i32_1 = arith.constant 0 : i32
    return %c0_i32, %c0_i32_0 : i32, i32
  }
  func.func @transform_3(%arg0: i32) -> (i32, i32) {
    %c0_i32 = arith.constant 0 : i32
    %c0_i32_0 = arith.constant 0 : i32
    %c0_i32_1 = arith.constant 0 : i32
    return %c0_i32, %c0_i32_0 : i32, i32
  }
  func.func @transform_4(%arg0: i32) -> (i32, i32) {
    %c0_i32 = arith.constant 0 : i32
    %c0_i32_0 = arith.constant 0 : i32
    %c0_i32_1 = arith.constant 0 : i32
    return %c0_i32, %c0_i32_0 : i32, i32
  }
  func.func @transform_5(%arg0: i32) -> (i32, i32) {
    %c0_i32 = arith.constant 0 : i32
    %c0_i32_0 = arith.constant 0 : i32
    %c0_i32_1 = arith.constant 0 : i32
    return %c0_i32, %c0_i32_0 : i32, i32
  }
  func.func @transform_6(%arg0: i32) -> (i32, i32) {
    %c0_i32 = arith.constant 0 : i32
    %c0_i32_0 = arith.constant 0 : i32
    %c0_i32_1 = arith.constant 0 : i32
    return %c0_i32, %c0_i32_0 : i32, i32
  }
  func.func @transform_7(%arg0: i32) -> (i32, i32) {
    %c0_i32 = arith.constant 0 : i32
    %c0_i32_0 = arith.constant 0 : i32
    %c0_i32_1 = arith.constant 0 : i32
    return %c0_i32, %c0_i32_0 : i32, i32
  }
  func.func @transform_8(%arg0: i32) -> (i32, i32) {
    %c0_i32 = arith.constant 0 : i32
    %c0_i32_0 = arith.constant 0 : i32
    %c0_i32_1 = arith.constant 0 : i32
    return %c0_i32, %c0_i32_0 : i32, i32
  }
  func.func @transform_9(%arg0: i32) -> (i32, i32) {
    %c0_i32 = arith.constant 0 : i32
    %c0_i32_0 = arith.constant 0 : i32
    %c0_i32_1 = arith.constant 0 : i32
    return %c0_i32, %c0_i32_0 : i32, i32
  }
  func.func @transform_10(%arg0: i32) -> (i32, i32) {
    %c0_i32 = arith.constant 0 : i32
    %c0_i32_0 = arith.constant 0 : i32
    %c0_i32_1 = arith.constant 0 : i32
    return %c0_i32, %c0_i32_0 : i32, i32
  }
  func.func @transform_11(%arg0: i32) -> (i32, i32) {
    %c0_i32 = arith.constant 0 : i32
    %c0_i32_0 = arith.constant 0 : i32
    %c0_i32_1 = arith.constant 0 : i32
    return %c0_i32, %c0_i32_0 : i32, i32
  }
  func.func @transform_12(%arg0: i32) -> (i32, i32) {
    %c0_i32 = arith.constant 0 : i32
    %c0_i32_0 = arith.constant 0 : i32
    %c0_i32_1 = arith.constant 0 : i32
    return %c0_i32, %c0_i32_0 : i32, i32
  }
  func.func @transform_13(%arg0: i32) -> (i32, i32) {
    %c0_i32 = arith.constant 0 : i32
    %c0_i32_0 = arith.constant 0 : i32
    %c0_i32_1 = arith.constant 0 : i32
    return %c0_i32, %c0_i32_0 : i32, i32
  }
  func.func @transform_14(%arg0: i32) -> (i32, i32) {
    %c0_i32 = arith.constant 0 : i32
    %c0_i32_0 = arith.constant 0 : i32
    %c0_i32_1 = arith.constant 0 : i32
    return %c0_i32, %c0_i32_0 : i32, i32
  }
  func.func @transform_15(%arg0: i32) -> (i32, i32) {
    %c0_i32 = arith.constant 0 : i32
    %c0_i32_0 = arith.constant 0 : i32
    %c0_i32_1 = arith.constant 0 : i32
    return %c0_i32, %c0_i32_0 : i32, i32
  }
  func.func @transform_16(%arg0: i32) -> (i32, i32, i32) {
    %c0_i32 = arith.constant 0 : i32
    %c0_i32_0 = arith.constant 0 : i32
    %c0_i32_1 = arith.constant 0 : i32
    %c0_i32_2 = arith.constant 0 : i32
    return %c0_i32, %c0_i32_0, %c0_i32_1 : i32, i32, i32
  }
  func.func @transform_17(%arg0: i32) -> (i32, i32) {
    %c0_i32 = arith.constant 0 : i32
    %c0_i32_0 = arith.constant 0 : i32
    %c0_i32_1 = arith.constant 0 : i32
    return %c0_i32, %c0_i32_0 : i32, i32
  }
}

</mosaic_0001>

<bundles_post_ra>
// kernel: _lambda_.1
= control target key start
LH: loop header
LB: loop body
LE: loop exit
PB: predicated region body
PF: predicated region fallthrough
CT: control target
= control target key end

     0   :  { %s4297_s0 = inlined_call_operand.vmem [shape: f32[64,12], index: 0, kind: input, shape index: {}]   ;;  %s4298_s1 = inlined_call_operand.vmem [shape: f32[64,12], index: 1, kind: input, shape index: {}]   ;;  %s4299_s2 = inlined_call_operand.vmem [shape: f32[64,12], index: 2, kind: input, shape index: {}]   ;;  %s4300_s3 = inlined_call_operand.vmem [shape: f32[64,12], index: 3, kind: input, shape index: {}]   ;;  %s4301_s4 = inlined_call_operand.vmem [shape: f32[64,12], index: 4, kind: input, shape index: {}]   ;;  %s4302_s5 = inlined_call_operand.vmem [shape: f32[12,44], index: 5, kind: input, shape index: {}]   ;;  %s4303_s6 = inlined_call_operand.vmem [shape: f32[1,44], index: 6, kind: input, shape index: {}]   ;;  %s4304_s7 = inlined_call_operand.vmem [shape: f32[32,140], index: 7, kind: input, shape index: {}]   ;;  %s4305_s8 = inlined_call_operand.vmem [shape: f32[1,12], index: 8, kind: input, shape index: {}]   ;;  %s4306_s9 = inlined_call_operand.vmem [shape: f32[12,12], index: 9, kind: input, shape index: {}]   ;;  %s4307_s10 = inlined_call_operand.vmem [shape: f32[1,12], index: 10, kind: input, shape index: {}]   ;;  %s4308_s11 = inlined_call_operand.vmem [shape: f32[12,12], index: 11, kind: input, shape index: {}]   ;;  %s4309_s12 = inlined_call_operand.vmem [shape: f32[1,12], index: 12, kind: input, shape index: {}]   ;;  %s4310_s13 = inlined_call_operand.vmem [shape: f32[12,140], index: 13, kind: input, shape index: {}]   ;;  %s4311_s14 = inlined_call_operand.vmem [shape: f32[1,128], index: 14, kind: input, shape index: {}]   ;;  %s4312_s15 = inlined_call_operand.vmem [shape: f32[12,128], index: 15, kind: input, shape index: {}]   ;;  %s4313_s16 = inlined_call_operand.vmem [shape: f32[8,8,12], index: 16, kind: output, shape index: {0}]   ;;  %s4314_s17 = inlined_call_operand.hbm [shape: f32[1,1], index: 17, kind: output, shape index: {1}]  }
   0x1   :  { %4317 = sst [smem:[#allocation5_spill]] %s4297_s0 }
   0x2   :  { %4318 = sst [smem:[#allocation6_spill]] %s4298_s1 }
   0x3   :  { %v56_v0 = vld [vmem:[%s4302_s5] sm:$0xff]  ;;  %v57_v1 = vld [vmem:[%s4302_s5 + $0x8] sm:$0xf]  ;;  %vm307_vm0 = vcmask 1043456   ;;  %vm3463_vm1 = vmmov 1   ;;  %vm148_vm3 = vcmask 97280  }
   0x4   :  { %v108_v2 = vld [vmem:[%s4299_s2] sm:$0xff]  ;;  %v3163_v3 = vpack.c.bf16 %v57_v1, %v56_v0  ;;  %vm3570_vm2 = vmpackc.low %vm307_vm0, %vm3463_vm1 }
   0x5   :  { %3030 = vmatprep.mubr.msk.f32.mxu0 %vm148_vm3, %v108_v2 }
   0x6   :  { %3165 = vmatprep.subr.msk.bf16.mxu0 %vm3570_vm2, %v3163_v3 }
   0x7   :  { %23 = vsyncpa [#allocation3], 0  ;;  %3168 = vmatpush3.bf16.msk.msra.mxu0 %vm3570_vm2, %v3163_v3  ;;  %v109_v5 = vld [vmem:[%s4299_s2 + $0x8] sm:$0xff]  ;;  %v110_v6 = vld [vmem:[%s4299_s2 + $0x10] sm:$0xff]  ;;  %v3464_v17 = vmov 0.0   ;;  %s4321_s24 = sld [smem:[#allocation6_spill]] }
   0x8   :  { %v111_v7 = vld [vmem:[%s4299_s2 + $0x18] sm:$0xff]  ;;  %v112_v8 = vld [vmem:[%s4299_s2 + $0x20] sm:$0xff]  ;;  %v113_v9 = vld [vmem:[%s4299_s2 + $0x28] sm:$0xff]  ;;  %542 = vmatprep.mubr.f32.mxu1 %v3464_v17  ;;  %s3465_s23 = smov 96   ;;  %vm775_vm4 = vcmask 261120   ;;  %vm3467_vm5 = vmmov 0  }
   0x9   :  { %v114_v10 = vld [vmem:[%s4299_s2 + $0x30] sm:$0xff]  ;;  %v115_v11 = vld [vmem:[%s4299_s2 + $0x38] sm:$0xff]  ;;  %v72_v12 = vld [vmem:[%s4310_s13 + $0x8] sm:$0xff]  ;;  %s3468_s2 = smov 32   ;;  %vm2856_vm6 = vcmask 0  }
   0xa   :  { %3031 = vmatmul.mubr.msk.f32.vlgmr.msra.gmra.mrb[0].mxu0 %vm148_vm3, %v109_v5  ;;  %v74_v13 = vld [vmem:[%s4310_s13 + $0x18] sm:$0xf]  ;;  %v71_v14 = vld [vmem:[%s4310_s13] sm:$0xff]  ;;  %v73_v16 = vld [vmem:[%s4310_s13 + $0x10] sm:$0xf] }
   0xb   :  { %3033 = vmatprep.mubr.msk.f32.mxu0 %vm148_vm3, %v110_v6  ;;  %v3169_v15 = vpack.c.bf16 %v74_v13, %v72_v12  ;;  %v3172_v18 = vpack.c.bf16 %v73_v16, %v71_v14  ;;  %v69_v19 = vld [vmem:[%s4308_s11] sm:$0xff]  ;;  %v70_v20 = vld [vmem:[%s4308_s11 + $0x8] sm:$0xf]  ;;  %v62_v49 = vld [vmem:[%s4304_s7 + $0x18] sm:$0xff]  ;;  %s4322_s11 = sld [smem:[#allocation5_spill]] }
   0xc   :  { %v3175_v21 = vpack.c.bf16 %v70_v20, %v69_v19  ;;  %v2878_v26 = vld [vmem:[%s4303_s6] ss:$0 sm:$0xff]  ;;  %v60_v48 = vld [vmem:[%s4304_s7 + $0x8] sm:$0xff]  ;;  %v3466_v20 = vmov 0.0|0.0  }
   0xd   :  { %3171 = vmatprep.subr.msk.bf16.mxu1 %vm3570_vm2, %v3169_v15  ;;  %v3633_v22 = vld [vmem:[%s4321_s24] sm:$0xff]  ;;  %v3645_v23 = vld [vmem:[%s4321_s24 + $0x8] sm:$0xff]  ;;  %v3653_v24 = vld [vmem:[%s4321_s24 + $0x10] sm:$0xff]  ;;  %v3683_v53 = vpack.c.bf16 %v62_v49, %v60_v48 }
   0xe   :  { %3034 = vmatmul.mubr.msk.f32.gmra.mrb[2].mxu0 %vm148_vm3, %v111_v7  ;;  %3174 = vmatpush1.bf16.msk.msra.mxu1 %vm3570_vm2, %v3172_v18  ;;  %v3661_v25 = vld [vmem:[%s4321_s24 + $0x18] sm:$0xff]  ;;  %v3672_v43 = vld [vmem:[%s4321_s24 + $0x20] sm:$0xff]  ;;  %v3689_v61 = vld [vmem:[%s4321_s24 + $0x28] sm:$0xff] }
   0xf   :  { %3036 = vmatprep.mubr.msk.f32.mxu0 %vm148_vm3, %v112_v8  ;;  %3177 = vmatprep.subr.msk.bf16.mxu0 %vm3570_vm2, %v3175_v21  ;;  %v106_v5 = vld [vmem:[%s4321_s24 + $0x30] sm:$0xff]  ;;  %v67_v16 = vld [vmem:[%s4306_s9] sm:$0xff]  ;;  %v68_v18 = vld [vmem:[%s4306_s9 + $0x8] sm:$0xf] }
  0x10   :  { %3180 = vmatpush3.bf16.msk.msra.mxu0 %vm3570_vm2, %v3175_v21  ;;  %v3724_v19 = vpack.c.bf16 %v68_v18, %v67_v16  ;;  %3189 = vmatprep.subr.bf16.mxu1 %v3466_v20 }
  0x11   :  { %2890 = vmatmul.mubr.msk.f32.vlgmr.msra.gmra.mrb[0].mxu1 %vm148_vm3, %v3633_v22  ;;  %3182 = vmatprep.subr.bf16.mxu0 %v3683_v53 }
  0x12   :  { %3037 = vmatmul.mubr.msk.f32.gmra.mrb[4].mxu0 %vm148_vm3, %v113_v9  ;;  %548 = vmatprep.mubr.f32.mxu1 %v3464_v17 }
  0x13   :  { %3039 = vmatprep.mubr.msk.f32.mxu0 %vm148_vm3, %v114_v10  ;;  %v107_v10 = vld [vmem:[%s4321_s24 + $0x38] sm:$0xff]  ;;  %3192 = vmatpush3.bf16.msk.msra.mxu1 %vm3570_vm2, %v3724_v19 }
  0x14   :  { %3198 = vmatprep.subr.bf16.mxu1 %v3683_v53 }
  0x15   :  { %2891 = vmatmul.mubr.msk.f32.gmra.mrb[2].mxu1 %vm148_vm3, %v3645_v23 }
  0x16   :  { %3040 = vmatmul.mubr.msk.f32.gmra.mrb[6].mxu0 %vm148_vm3, %v115_v11  ;;  %554 = vmatprep.mubr.f32.mxu1 %v3464_v17 }
  0x19   :  { %2892 = vmatmul.mubr.msk.f32.gmra.mrb[4].mxu1 %vm148_vm3, %v3653_v24 }
  0x1a   :  { %560 = vmatprep.mubr.f32.mxu1 %v3464_v17 }
  0x1d   :  { %2893 = vmatmul.mubr.msk.f32.gmra.mrb[6].mxu1 %vm148_vm3, %v3661_v25 }
  0x1e   :  { %566 = vmatprep.mubr.f32.mxu1 %v3464_v17 }
  0x21   :  { %2894 = vmatmul.mubr.msk.f32.gmra.mrb[8].mxu1 %vm148_vm3, %v3672_v43 }
  0x22   :  { %572 = vmatprep.mubr.f32.mxu1 %v3464_v17 }
  0x25   :  { %2895 = vmatmul.mubr.msk.f32.gmra.mrb[10].mxu1 %vm148_vm3, %v3689_v61 }
  0x26   :  { %578 = vmatprep.mubr.f32.mxu1 %v3464_v17 }
  0x29   :  { %2896 = vmatmul.mubr.msk.f32.gmra.mrb[12].mxu1 %vm148_vm3, %v106_v5 }
  0x2a   :  { %584 = vmatprep.mubr.f32.mxu1 %v3464_v17 }
  0x2d   :  { %2897 = vmatmul.mubr.msk.f32.gmra.mrb[14].mxu1 %vm148_vm3, %v107_v10 }
  0x2e   :  { %3062 = vmatprep.mubr.msk.f32.mxu1 %vm3467_vm5, %v3464_v17 }
  0xdd   :  { %v3032_v27 = vpop.f32.mrb[0].mxu0 }
  0xde   :  { %v383_v28 = vadd.f32 %v3032_v27, %v2878_v26  ;;  %v377_v29 = vpop.f32.mrb[1].mxu0 }
  0xdf   :  { %v378_v30 = vadd.f32 %v2878_v26, %v377_v29 }
  0xe0   :  { %v417_v31 = vmax.f32 %v383_v28, 0.0 }
  0xe1   :  { %v416_v32 = vmax.f32 %v378_v30, 0.0  ;;  %v3035_v33 = vpop.f32.mrb[2].mxu0 }
  0xe2   :  { %v425_v34 = vsub.f32 0.0, %v417_v31  ;;  %v393_v35 = vadd.f32 %v3035_v33, %v2878_v26  ;;  %v387_v36 = vpop.f32.mrb[3].mxu0  ;;  %v61_v33 = vld [vmem:[%s4304_s7 + $0x10] sm:$0xff] }
  0xe3   :  { %v424_v37 = vsub.f32 0.0, %v416_v32  ;;  %v388_v38 = vadd.f32 %v2878_v26, %v387_v36  ;;  %v59_v32 = vld [vmem:[%s4304_s7] sm:$0xff]  ;;  %v66_v36 = vld [vmem:[%s4304_s7 + $0x38] sm:$0xff] }
  0xe4   :  { %v419_v39 = vmax.f32 %v393_v35, 0.0  ;;  %v434_v44 = vmul.f32 1.442695, %v425_v34  ;;  %v3740_v28 = vpop.f32.mrb[0].mxu1  ;;  %v64_v35 = vld [vmem:[%s4304_s7 + $0x28] sm:$0xff] }
  0xe5   :  { %v432_v40 = vmul.f32 1.442695, %v424_v37  ;;  %v418_v41 = vmax.f32 %v388_v38, 0.0  ;;  %v3038_v42 = vpop.f32.mrb[4].mxu0  ;;  %v546_v29 = vpop.f32.mrb[1].mxu1  ;;  %v3757_v37 = vpack.c.bf16 %v61_v33, %v59_v32  ;;  %v3759_v38 = vpack.c.bf16 %v66_v36, %v64_v35 }
  0xe6   :  { %v427_v45 = vsub.f32 0.0, %v419_v39  ;;  %v403_v46 = vadd.f32 %v3038_v42, %v2878_v26  ;;  %v397_v47 = vpop.f32.mrb[5].mxu0  ;;  %v63_v39 = vld [vmem:[%s4304_s7 + $0x20] sm:$0xff] }
  0xe7   :  { %3347 = vpow2.f32 %v432_v40  ;;  %v426_v50 = vsub.f32 0.0, %v418_v41  ;;  %v398_v51 = vadd.f32 %v2878_v26, %v397_v47  ;;  %v65_v40 = vld [vmem:[%s4304_s7 + $0x30] sm:$0xff] }
  0xe8   :  { %v421_v52 = vmax.f32 %v403_v46, 0.0  ;;  %3349 = vpow2.f32 %v434_v44  ;;  %v438_v57 = vmul.f32 1.442695, %v427_v45  ;;  %v3742_v30 = vpop.f32.mrb[2].mxu1  ;;  %v3770_v44 = vpack.c.bf16 %v65_v40, %v63_v39 }
  0xe9   :  { %v436_v54 = vmul.f32 1.442695, %v426_v50  ;;  %v420_v55 = vmax.f32 %v398_v51, 0.0  ;;  %v3041_v56 = vpop.f32.mrb[6].mxu0  ;;  %v552_v31 = vpop.f32.mrb[3].mxu1 }
  0xea   :  { %v429_v58 = vsub.f32 0.0, %v421_v52  ;;  %v413_v59 = vadd.f32 %v3041_v56, %v2878_v26  ;;  %v407_v60 = vpop.f32.mrb[7].mxu0 }
  0xeb   :  { %3351 = vpow2.f32 %v436_v54  ;;  %v428_v62 = vsub.f32 0.0, %v420_v55  ;;  %v408_v63 = vadd.f32 %v2878_v26, %v407_v60 }
  0xec   :  { %v423_v0 = vmax.f32 %v413_v59, 0.0  ;;  %3353 = vpow2.f32 %v438_v57  ;;  %v442_v3 = vmul.f32 1.442695, %v429_v58  ;;  %v3783_v51 = vpop.f32.mrb[4].mxu1 }
  0xed   :  { %v440_v1 = vmul.f32 1.442695, %v428_v62  ;;  %v422_v2 = vmax.f32 %v408_v63, 0.0  ;;  %v558_v52 = vpop.f32.mrb[5].mxu1 }
  0xee   :  { %v431_v6 = vsub.f32 0.0, %v423_v0 }
  0xef   :  { %3355 = vpow2.f32 %v440_v1  ;;  %v430_v7 = vsub.f32 0.0, %v422_v2  ;;  %v2908_v2 = vld [vmem:[%s4309_s12] ss:$0 sm:$0xff] }
  0xf0   :  { %3357 = vpow2.f32 %v442_v3  ;;  %v446_v11 = vmul.f32 1.442695, %v431_v6  ;;  %v3785_v54 = vpop.f32.mrb[6].mxu1 }
  0xf1   :  { %v3699_v8 = vpop.eup %3347  ;;  %v444_v9 = vmul.f32 1.442695, %v430_v7  ;;  %v564_v55 = vpop.f32.mrb[7].mxu1 }
  0xf2   :  { %611 = vrot.lane.b32.xlu0 %v3699_v8, %s3465_s23  ;;  %v3706_v12 = vpop.eup %3349  ;;  %v774_v50 = vmul.f32 0.0, %v3699_v8 }
  0xf3   :  { %3359 = vpow2.f32 %v444_v9 }
  0xf4   :  { %3361 = vpow2.f32 %v446_v11  ;;  %v3787_v56 = vpop.f32.mrb[8].mxu1 }
  0xf5   :  { %v3708_v13 = vpop.eup %3351  ;;  %v570_v57 = vpop.f32.mrb[9].mxu1 }
  0xf6   :  { %615 = vrot.lane.b32.xlu1 %v3708_v13, %s3465_s23  ;;  %613 = vrot.lane.b32.xlu0 %v3706_v12, %s3465_s23  ;;  %v3712_v14 = vpop.eup %3353 }
  0xf8   :  { %v3789_v58 = vpop.f32.mrb[10].mxu1 }
  0xf9   :  { %v3714_v15 = vpop.eup %3355  ;;  %v576_v59 = vpop.f32.mrb[11].mxu1 }
  0xfa   :  { %617 = vrot.lane.b32.xlu1 %v3712_v14, %s3465_s23  ;;  %619 = vrot.lane.b32.xlu0 %v3714_v15, %s3465_s23  ;;  %v3727_v21 = vpop.eup %3357 }
  0xfc   :  { %v3791_v60 = vpop.f32.mrb[12].mxu1 }
  0xfd   :  { %v3732_v26 = vpop.eup %3359  ;;  %v582_v62 = vpop.f32.mrb[13].mxu1 }
  0xfe   :  { %621 = vrot.lane.b32.xlu1 %v3727_v21, %s3465_s23  ;;  %623 = vrot.lane.b32.xlu0 %v3732_v26, %s3465_s23  ;;  %v3737_v27 = vpop.eup %3361 }
 0x100   :  { %v586_v63 = vpop.f32.mrb[14].mxu1 }
 0x101   :  { %v587_v0 = vpop.f32.mrb[15].mxu1 }
 0x102   :  { %625 = vrot.lane.b32.xlu1 %v3737_v27, %s3465_s23 }
 0x164   :  { %v612_v34 = vpop.permute.xlu0 %611 }
 0x165   :  { %3046 = vmatprep.mubr.msk.f32.mxu0 %vm148_vm3, %v612_v34 }
 0x168   :  { %v616_v41 = vpop.permute.xlu1 %615  ;;  %v614_v42 = vpop.permute.xlu0 %613 }
 0x169   :  { %3047 = vmatmul.mubr.msk.f32.vlgmr.msra.gmra.mrb[8].mxu0 %vm148_vm3, %v614_v42 }
 0x16a   :  { %3184 = vmatpush1.bf16.msra.mxu0 %v3757_v37  ;;  %3049 = vmatprep.mubr.msk.f32.mxu0 %vm148_vm3, %v616_v41 }
 0x16b   :  { %3186 = vmatprep.subr.bf16.mxu0 %v3759_v38 }
 0x16c   :  { %v618_v45 = vpop.permute.xlu1 %617  ;;  %v620_v46 = vpop.permute.xlu0 %619 }
 0x16d   :  { %3050 = vmatmul.mubr.msk.f32.gmra.mrb[10].mxu0 %vm148_vm3, %v618_v45  ;;  %v92_v45 = vld [vmem:[%s4322_s11] sm:$0xff] }
 0x16e   :  { %3052 = vmatprep.mubr.msk.f32.mxu0 %vm148_vm3, %v620_v46  ;;  %3188 = vmatpush1.bf16.msra.mxu0 %v3770_v44 }
 0x16f   :  { %3193 = vmatprep.subr.bf16.mxu0 %v3466_v20 }
 0x170   :  { %v622_v47 = vpop.permute.xlu1 %621  ;;  %v624_v48 = vpop.permute.xlu0 %623 }
 0x171   :  { %3053 = vmatmul.mubr.msk.f32.gmra.mrb[12].mxu0 %vm148_vm3, %v622_v47  ;;  %v3818_v47 = vld [vmem:[%s4305_s8] ss:$0 sm:$0xff] }
 0x172   :  { %3055 = vmatprep.mubr.msk.f32.mxu0 %vm148_vm3, %v624_v48  ;;  %v140_v48 = vsub.f32 1.0, %v3633_v22 }
 0x174   :  { %v626_v49 = vpop.permute.xlu1 %625 }
 0x175   :  { %3056 = vmatmul.mubr.msk.f32.gmra.mrb[14].mxu0 %vm148_vm3, %v626_v49 }
 0x176   :  { %843 = vmatprep.mubr.f32.mxu0 %v3464_v17 }
 0x179   :  { %2909 = vmatmul.mubr.msk.f32.vlgmr.msra.gmra.mrb[16].mxu0 %vm775_vm4, %v774_v50 }
 0x17a   :  { %3069 = vmatprep.mubr.msk.f32.mxu0 %vm3467_vm5, %v3464_v17 }
 0x23c   :  { %v3048_v1 = vpop.f32.mrb[8].mxu0 }
 0x23d   :  { %v718_v3 = vadd.f32 %v3048_v1, %v552_v31  ;;  %v712_v5 = vpop.f32.mrb[9].mxu0  ;;  %v76_v1 = vld [vmem:[%s4312_s15 + $0x8] sm:$0xf] }
 0x23e   :  { %v713_v6 = vadd.f32 %v712_v5, %v546_v29  ;;  %v116_v5 = vld [vmem:[%s4300_s3] sm:$0xff] }
 0x23f   :  { %v3800_v7 = vadd.f32 %v2908_v2, %v718_v3  ;;  %v3846_v3 = vld [vmem:[%s4307_s10] ss:$0 sm:$0xff] }
 0x240   :  { %v3051_v8 = vpop.f32.mrb[10].mxu0  ;;  %v758_v41 = vadd.f32 %v2908_v2, %v713_v6 }
 0x241   :  { %v728_v9 = vadd.f32 %v3051_v8, %v564_v55  ;;  %v722_v10 = vpop.f32.mrb[11].mxu0  ;;  %v132_v55 = vmul.f32 %v3633_v22, %v92_v45  ;;  %v75_v22 = vld [vmem:[%s4312_s15] sm:$0xff]  ;;  %s3470_s15 = smov [#allocation2]  }
 0x242   :  { %v723_v11 = vadd.f32 %v722_v10, %v558_v52 }
 0x243   :  { %v3802_v16 = vadd.f32 %v2908_v2, %v728_v9 }
 0x244   :  { %v3804_v18 = vadd.f32 %v2908_v2, %v723_v11  ;;  %v3054_v32 = vpop.f32.mrb[12].mxu0 }
 0x245   :  { %v738_v33 = vadd.f32 %v3054_v32, %v576_v59  ;;  %v732_v34 = vpop.f32.mrb[13].mxu0 }
 0x246   :  { %v733_v35 = vadd.f32 %v732_v34, %v570_v57  ;;  %v766_v57 = vsub.f32 1.0, %v758_v41 }
 0x247   :  { %v3806_v36 = vadd.f32 %v2908_v2, %v738_v33 }
 0x248   :  { %v3808_v39 = vadd.f32 %v2908_v2, %v733_v35  ;;  %v3057_v31 = vpop.f32.mrb[14].mxu0 }
 0x249   :  { %v748_v29 = vadd.f32 %v3057_v31, %v587_v0  ;;  %v742_v40 = vpop.f32.mrb[15].mxu0 }
 0x24a   :  { %v743_v42 = vadd.f32 %v742_v40, %v582_v62 }
 0x24b   :  { %v3813_v46 = vadd.f32 %v2908_v2, %v748_v29 }
 0x24c   :  { %v3821_v49 = vadd.f32 %v2908_v2, %v743_v42  ;;  %v845_v50 = vpop.f32.mrb[16].mxu0  ;;  %v3837_v2 = vpack.c.bf16 %v76_v1, %v75_v22 }
 0x24d   :  { %v847_v52 = vpop.f32.mrb[17].mxu0 }
 0x24e   :  { %v850_v59 = vadd.f32 %v3818_v47, %v847_v52  ;;  %3196 = vmatpush3.bf16.msk.msra.mxu0 %vm3570_vm2, %v3837_v2 }
 0x24f   :  { %3205 = vmatprep.subr.bf16.mxu0 %v3466_v20 }
 0x250   :  { %v851_v62 = vmul.f32 %v850_v59, %v140_v48  ;;  %v930_v63 = vmul.f32 %v850_v59, %v766_v57  ;;  %v935_v9 = vsub.f32 %v116_v5, %v850_v59 }
 0x252   :  { %v852_v0 = vadd.f32 %v851_v62, %v132_v55  ;;  %v936_v34 = vand.u32 2147483647, %v935_v9 }
 0x254   :  { %3063 = vmatmul.mubr.msk.f32.vlgmr.msra.gmra.mrb[16].mxu1 %vm148_vm3, %v852_v0 }
 0x255   :  { %3200 = vmatpush1.bf16.msra.mxu1 %v3757_v37  ;;  %1119 = vmatprep.mubr.f32.mxu1 %v3464_v17 }
 0x256   :  { %3202 = vmatprep.subr.bf16.mxu1 %v3759_v38 }
 0x259   :  { %3204 = vmatpush1.bf16.msra.mxu1 %v3770_v44 }
 0x25a   :  { %3214 = vmatprep.subr.bf16.mxu1 %v3683_v53 }
 0x327   :  { %v925_v6 = vpop.f32.mrb[16].mxu1 }
 0x328   :  { %v926_v8 = vadd.f32 %v3846_v3, %v925_v6  ;;  %v3064_v10 = vpop.f32.mrb[17].mxu1 }
 0x32a   :  { %v929_v11 = vmul.f32 %v926_v8, %v758_v41  ;;  %v937_v32 = vsub.f32 %v116_v5, %v926_v8  ;;  %v3868_v41 = vld [vmem:[%s4311_s14] ss:$0 sm:$0xff]  ;;  %s3469_s14 = smov 64  }
 0x32c   :  { %v931_v33 = vadd.f32 %v930_v63, %v929_v11  ;;  %v938_v35 = vand.u32 2147483647, %v937_v32 }
 0x32e   :  { %v932_v31 = vmul.f32 %v931_v33, %v140_v48  ;;  %v939_v29 = vadd.f32 %v938_v35, %v936_v34  ;;  %v940_v40 = vsub.f32 %v116_v5, %v931_v33  ;;  %v596_v48 = vadd.f32 %v3868_v41, %v3740_v28 }
 0x330   :  { %v933_v42 = vadd.f32 %v932_v31, %v132_v55  ;;  %v941_v45 = vand.u32 2147483647, %v940_v40  ;;  %v141_v31 = vsub.f32 1.0, %v3645_v23 }
 0x332   :  { %934 = vst.msk [vmem:[%s4313_s16] sm:$0xff] %vm148_vm3, %v933_v42  ;;  %3070 = vmatmul.mubr.msk.f32.vlgmr.msra.gmra.mrb[18].mxu0 %vm148_vm3, %v933_v42  ;;  %v3857_v52 = vadd.f32 %v941_v45, %v939_v29  ;;  %v767_v45 = vsub.f32 1.0, %v3800_v7 }
 0x333   :  { %3208 = vmatpush3.bf16.msk.msra.mxu0 %vm3570_vm2, %v3724_v19  ;;  %3076 = vmatprep.mubr.msk.f32.mxu0 %vm3467_vm5, %v3464_v17 }
 0x334   :  { %3209 = vmatprep.subr.bf16.mxu0 %v3466_v20 }
 0x405   :  { %v1017_v55 = vpop.f32.mrb[18].mxu0 }
 0x406   :  { %v1018_v57 = vadd.f32 %v1017_v55, %v596_v48  ;;  %v3071_v59 = vpop.f32.mrb[19].mxu0 }
 0x408   :  { %v1021_v62 = vadd.f32 %v1018_v57, %v845_v50 }
 0x40a   :  { %3363 = vtanh.f32 %v1021_v62  ;;  %v2914_v0 = vmul.f32 -1.442695, %v1021_v62 }
 0x40c   :  { %3365 = vpow2.f32 %v2914_v0 }
 0x414   :  { %v3364_v63 = vpop.eup %3363 }
 0x415   :  { %1031 = vrot.lane.b32.xlu0 %v3364_v63, %s3468_s2 }
 0x416   :  { %v3366_v22 = vpop.eup %3365 }
 0x417   :  { %v1025_v1 = vadd.f32 1.0, %v3366_v22 }
 0x419   :  { %3367 = vrcp.f32 %v1025_v1 }
 0x423   :  { %v3368_v5 = vpop.eup %3367 }
 0x424   :  { %v1029_v28 = vmul.f32 0.0, %v3368_v5 }
 0x487   :  { %v1032_v6 = vpop.permute.xlu0 %1031 }
 0x488   :  { %v1034_v8 = vmul.f32 %v3368_v5, %v1032_v6 }
 0x48a   :  { %1036 = vrot.lane.b32.xlu1 %v1034_v8, %s3468_s2 }
 0x48e   :  { %1046 = vrot.lane.b32.xlu1 %v3706_v12, %s3469_s14  ;;  %v93_v12 = vld [vmem:[%s4322_s11 + $0x8] sm:$0xff] }
 0x48f   :  { %v133_v42 = vmul.f32 %v3645_v23, %v93_v12  ;;  %v117_v23 = vld [vmem:[%s4300_s3 + $0x8] sm:$0xff] }
 0x4fc   :  { %v1037_v50 = vpop.permute.xlu1 %1036 }
 0x4fd   :  { %v3876_v9 = vadd.f32 %v1037_v50, %v1029_v28 }
 0x4ff   :  { %3369 = vtanh.f32 %v3876_v9 }
 0x500   :  { %v1047_v33 = vpop.permute.xlu1 %1046 }
 0x509   :  { %v3370_v10 = vpop.eup %3369 }
 0x50a   :  { %1042 = vrot.lane.b32.xlu0 %v3370_v10, %s3468_s2 }
 0x57c   :  { %v1043_v11 = vpop.permute.xlu0 %1042 }
 0x57d   :  { %v1045_v32 = vmul.f32 %v3368_v5, %v1043_v11 }
 0x57f   :  { %v1049_v34 = vmul.f32 %v1047_v33, %v1045_v32 }
 0x581   :  { %1051 = vrot.lane.b32.xlu0 %v1049_v34, %s3469_s14 }
 0x5f3   :  { %v1052_v35 = vpop.permute.xlu0 %1051 }
 0x5f4   :  { %2915 = vmatmul.mubr.msk.f32.vlgmr.msra.gmra.mrb[18].mxu1 %vm775_vm4, %v1052_v35 }
 0x5f5   :  { %3216 = vmatpush1.bf16.msra.mxu1 %v3757_v37  ;;  %1390 = vmatprep.mubr.f32.mxu1 %v3464_v17 }
 0x5f6   :  { %3218 = vmatprep.subr.bf16.mxu1 %v3759_v38 }
 0x5f9   :  { %3220 = vmatpush1.bf16.msra.mxu1 %v3770_v44 }
 0x5fa   :  { %3230 = vmatprep.subr.bf16.mxu1 %v3683_v53 }
 0x6c7   :  { %v1121_v29 = vpop.f32.mrb[18].mxu1 }
 0x6c8   :  { %v1123_v40 = vpop.f32.mrb[19].mxu1 }
 0x6c9   :  { %v1126_v48 = vadd.f32 %v3818_v47, %v1123_v40 }
 0x6cb   :  { %v1127_v55 = vmul.f32 %v1126_v48, %v141_v31  ;;  %v1203_v57 = vmul.f32 %v1126_v48, %v767_v45  ;;  %v1209_v0 = vsub.f32 %v117_v23, %v1126_v48 }
 0x6cd   :  { %v1128_v59 = vadd.f32 %v1127_v55, %v133_v42  ;;  %v1210_v8 = vand.u32 2147483647, %v1209_v0 }
 0x6cf   :  { %3077 = vmatmul.mubr.msk.f32.vlgmr.msra.gmra.mrb[20].mxu0 %vm148_vm3, %v1128_v59 }
 0x6d0   :  { %3212 = vmatpush3.bf16.msk.msra.mxu0 %vm3570_vm2, %v3837_v2  ;;  %3083 = vmatprep.mubr.msk.f32.mxu0 %vm3467_vm5, %v3464_v17 }
 0x6d1   :  { %3221 = vmatprep.subr.bf16.mxu0 %v3466_v20 }
 0x7a2   :  { %v1198_v62 = vpop.f32.mrb[20].mxu0 }
 0x7a3   :  { %v1199_v63 = vadd.f32 %v3846_v3, %v1198_v62  ;;  %v3078_v22 = vpop.f32.mrb[21].mxu0 }
 0x7a5   :  { %v1202_v1 = vmul.f32 %v1199_v63, %v3800_v7  ;;  %v1211_v5 = vsub.f32 %v117_v23, %v1199_v63  ;;  %v597_v7 = vadd.f32 %v3868_v41, %v3742_v30 }
 0x7a7   :  { %v1204_v6 = vadd.f32 %v1203_v57, %v1202_v1  ;;  %v1212_v28 = vand.u32 2147483647, %v1211_v5 }
 0x7a9   :  { %v1205_v50 = vmul.f32 %v1204_v6, %v141_v31  ;;  %v1213_v10 = vadd.f32 %v1212_v28, %v1210_v8  ;;  %v1214_v11 = vsub.f32 %v117_v23, %v1204_v6 }
 0x7ab   :  { %v1206_v32 = vadd.f32 %v1205_v50, %v133_v42  ;;  %v1215_v33 = vand.u32 2147483647, %v1214_v11 }
 0x7ad   :  { %2918 = vst.msk [vmem:[%s4313_s16 + $0x8] sm:$0xff] %vm148_vm3, %v1206_v32  ;;  %3084 = vmatmul.mubr.msk.f32.vlgmr.msra.gmra.mrb[22].mxu0 %vm148_vm3, %v1206_v32  ;;  %v3911_v34 = vadd.f32 %v1215_v33, %v1213_v10  ;;  %v768_v10 = vsub.f32 1.0, %v3804_v18 }
 0x7ae   :  { %3224 = vmatpush3.bf16.msk.msra.mxu0 %vm3570_vm2, %v3724_v19  ;;  %3090 = vmatprep.mubr.msk.f32.mxu0 %vm3467_vm5, %v3464_v17 }
 0x7af   :  { %3225 = vmatprep.subr.bf16.mxu0 %v3466_v20 }
 0x880   :  { %v1288_v35 = vpop.f32.mrb[22].mxu0 }
 0x881   :  { %v1289_v12 = vadd.f32 %v1288_v35, %v597_v7  ;;  %v3085_v31 = vpop.f32.mrb[23].mxu0 }
 0x883   :  { %v1292_v40 = vadd.f32 %v1289_v12, %v1121_v29 }
 0x885   :  { %3371 = vtanh.f32 %v1292_v40  ;;  %v2921_v45 = vmul.f32 -1.442695, %v1292_v40 }
 0x887   :  { %3373 = vpow2.f32 %v2921_v45 }
 0x88f   :  { %v3372_v42 = vpop.eup %3371 }
 0x890   :  { %1302 = vrot.lane.b32.xlu1 %v3372_v42, %s3468_s2 }
 0x891   :  { %v3374_v48 = vpop.eup %3373 }
 0x892   :  { %v1296_v55 = vadd.f32 1.0, %v3374_v48 }
 0x894   :  { %3375 = vrcp.f32 %v1296_v55 }
 0x89e   :  { %v3376_v57 = vpop.eup %3375 }
 0x89f   :  { %v1300_v30 = vmul.f32 %v3376_v57, %v3876_v9  ;;  %v142_v9 = vsub.f32 1.0, %v3653_v24 }
 0x902   :  { %v1303_v59 = vpop.permute.xlu1 %1302 }
 0x903   :  { %v1305_v23 = vmul.f32 %v3376_v57, %v1303_v59 }
 0x905   :  { %1307 = vrot.lane.b32.xlu0 %v1305_v23, %s3468_s2 }
 0x909   :  { %1317 = vrot.lane.b32.xlu0 %v3708_v13, %s3469_s14  ;;  %v94_v13 = vld [vmem:[%s4322_s11 + $0x10] sm:$0xff] }
 0x90a   :  { %v134_v50 = vmul.f32 %v3653_v24, %v94_v13  ;;  %v118_v24 = vld [vmem:[%s4300_s3 + $0x10] sm:$0xff] }
 0x977   :  { %v1308_v29 = vpop.permute.xlu0 %1307 }
 0x978   :  { %v3926_v62 = vadd.f32 %v1308_v29, %v1300_v30 }
 0x97a   :  { %3377 = vtanh.f32 %v3926_v62 }
 0x97b   :  { %v1318_v1 = vpop.permute.xlu0 %1317 }
 0x984   :  { %v3378_v63 = vpop.eup %3377 }
 0x985   :  { %1313 = vrot.lane.b32.xlu1 %v3378_v63, %s3468_s2 }
 0x9f7   :  { %v1314_v0 = vpop.permute.xlu1 %1313 }
 0x9f8   :  { %v1316_v22 = vmul.f32 %v3376_v57, %v1314_v0 }
 0x9fa   :  { %v1320_v5 = vmul.f32 %v1318_v1, %v1316_v22 }
 0x9fc   :  { %1322 = vrot.lane.b32.xlu1 %v1320_v5, %s3469_s14 }
 0xa6e   :  { %v1323_v6 = vpop.permute.xlu1 %1322 }
 0xa6f   :  { %2922 = vmatmul.mubr.msk.f32.vlgmr.msra.gmra.mrb[20].mxu1 %vm775_vm4, %v1323_v6 }
 0xa70   :  { %3232 = vmatpush1.bf16.msra.mxu1 %v3757_v37  ;;  %1661 = vmatprep.mubr.f32.mxu1 %v3464_v17 }
 0xa71   :  { %3234 = vmatprep.subr.bf16.mxu1 %v3759_v38 }
 0xa74   :  { %3236 = vmatpush1.bf16.msra.mxu1 %v3770_v44 }
 0xa75   :  { %3246 = vmatprep.subr.bf16.mxu1 %v3683_v53 }
 0xb42   :  { %v1392_v8 = vpop.f32.mrb[20].mxu1 }
 0xb43   :  { %v1394_v28 = vpop.f32.mrb[21].mxu1 }
 0xb44   :  { %v1397_v11 = vadd.f32 %v3818_v47, %v1394_v28 }
 0xb46   :  { %v1398_v32 = vmul.f32 %v1397_v11, %v142_v9  ;;  %v1474_v33 = vmul.f32 %v1397_v11, %v768_v10  ;;  %v1480_v31 = vsub.f32 %v118_v24, %v1397_v11 }
 0xb48   :  { %v1399_v7 = vadd.f32 %v1398_v32, %v134_v50  ;;  %v1481_v55 = vand.u32 2147483647, %v1480_v31 }
 0xb4a   :  { %3091 = vmatmul.mubr.msk.f32.vlgmr.msra.gmra.mrb[24].mxu0 %vm148_vm3, %v1399_v7 }
 0xb4b   :  { %3228 = vmatpush3.bf16.msk.msra.mxu0 %vm3570_vm2, %v3837_v2  ;;  %3097 = vmatprep.mubr.msk.f32.mxu0 %vm3467_vm5, %v3464_v17 }
 0xb4c   :  { %3237 = vmatprep.subr.bf16.mxu0 %v3466_v20 }
 0xc1d   :  { %v1469_v35 = vpop.f32.mrb[24].mxu0 }
 0xc1e   :  { %v1470_v12 = vadd.f32 %v3846_v3, %v1469_v35  ;;  %v3092_v40 = vpop.f32.mrb[25].mxu0 }
 0xc20   :  { %v1473_v42 = vmul.f32 %v1470_v12, %v3804_v18  ;;  %v1482_v45 = vsub.f32 %v118_v24, %v1470_v12  ;;  %v598_v18 = vadd.f32 %v3868_v41, %v3783_v51 }
 0xc22   :  { %v1475_v48 = vadd.f32 %v1474_v33, %v1473_v42  ;;  %v1483_v57 = vand.u32 2147483647, %v1482_v45 }
 0xc24   :  { %v1476_v59 = vmul.f32 %v1475_v48, %v142_v9  ;;  %v1484_v23 = vadd.f32 %v1483_v57, %v1481_v55  ;;  %v1485_v30 = vsub.f32 %v118_v24, %v1475_v48  ;;  %v769_v55 = vsub.f32 1.0, %v3802_v16 }
 0xc26   :  { %v1477_v29 = vadd.f32 %v1476_v59, %v134_v50  ;;  %v1486_v63 = vand.u32 2147483647, %v1485_v30 }
 0xc28   :  { %2925 = vst.msk [vmem:[%s4313_s16 + $0x10] sm:$0xff] %vm148_vm3, %v1477_v29  ;;  %3098 = vmatmul.mubr.msk.f32.vlgmr.msra.gmra.mrb[26].mxu0 %vm148_vm3, %v1477_v29  ;;  %v3961_v0 = vadd.f32 %v1486_v63, %v1484_v23 }
 0xc29   :  { %3240 = vmatpush3.bf16.msk.msra.mxu0 %vm3570_vm2, %v3724_v19  ;;  %3104 = vmatprep.mubr.msk.f32.mxu0 %vm3467_vm5, %v3464_v17 }
 0xc2a   :  { %3241 = vmatprep.subr.bf16.mxu0 %v3466_v20 }
 0xcfb   :  { %v1559_v22 = vpop.f32.mrb[26].mxu0 }
 0xcfc   :  { %v1560_v1 = vadd.f32 %v1559_v22, %v598_v18  ;;  %v3099_v5 = vpop.f32.mrb[27].mxu0 }
 0xcfe   :  { %v1563_v6 = vadd.f32 %v1560_v1, %v1392_v8 }
 0xd00   :  { %3379 = vtanh.f32 %v1563_v6  ;;  %v2928_v9 = vmul.f32 -1.442695, %v1563_v6 }
 0xd02   :  { %3381 = vpow2.f32 %v2928_v9 }
 0xd0a   :  { %v3380_v13 = vpop.eup %3379 }
 0xd0b   :  { %1573 = vrot.lane.b32.xlu0 %v3380_v13, %s3468_s2 }
 0xd0c   :  { %v3382_v28 = vpop.eup %3381 }
 0xd0d   :  { %v1567_v50 = vadd.f32 1.0, %v3382_v28 }
 0xd0f   :  { %3383 = vrcp.f32 %v1567_v50 }
 0xd19   :  { %v3384_v10 = vpop.eup %3383 }
 0xd1a   :  { %v1571_v51 = vmul.f32 %v3384_v10, %v3926_v62  ;;  %v143_v62 = vsub.f32 1.0, %v3661_v25 }
 0xd7d   :  { %v1574_v11 = vpop.permute.xlu0 %1573 }
 0xd7e   :  { %v1576_v32 = vmul.f32 %v3384_v10, %v1574_v11 }
 0xd80   :  { %1578 = vrot.lane.b32.xlu1 %v1576_v32, %s3468_s2 }
 0xd84   :  { %1588 = vrot.lane.b32.xlu1 %v3712_v14, %s3469_s14  ;;  %v95_v14 = vld [vmem:[%s4322_s11 + $0x18] sm:$0xff] }
 0xd85   :  { %v135_v48 = vmul.f32 %v3661_v25, %v95_v14  ;;  %v119_v25 = vld [vmem:[%s4300_s3 + $0x18] sm:$0xff] }
 0xdf2   :  { %v1579_v8 = vpop.permute.xlu1 %1578 }
 0xdf3   :  { %v3976_v33 = vadd.f32 %v1579_v8, %v1571_v51 }
 0xdf5   :  { %3385 = vtanh.f32 %v3976_v33 }
 0xdf6   :  { %v1589_v12 = vpop.permute.xlu1 %1588 }
 0xdff   :  { %v3386_v7 = vpop.eup %3385 }
 0xe00   :  { %1584 = vrot.lane.b32.xlu0 %v3386_v7, %s3468_s2 }
 0xe72   :  { %v1585_v24 = vpop.permute.xlu0 %1584 }
 0xe73   :  { %v1587_v35 = vmul.f32 %v3384_v10, %v1585_v24 }
 0xe75   :  { %v1591_v31 = vmul.f32 %v1589_v12, %v1587_v35 }
 0xe77   :  { %1593 = vrot.lane.b32.xlu0 %v1591_v31, %s3469_s14 }
 0xee9   :  { %v1594_v40 = vpop.permute.xlu0 %1593 }
 0xeea   :  { %2929 = vmatmul.mubr.msk.f32.vlgmr.msra.gmra.mrb[22].mxu1 %vm775_vm4, %v1594_v40 }
 0xeeb   :  { %3248 = vmatpush1.bf16.msra.mxu1 %v3757_v37  ;;  %1932 = vmatprep.mubr.f32.mxu1 %v3464_v17 }
 0xeec   :  { %3250 = vmatprep.subr.bf16.mxu1 %v3759_v38 }
 0xeef   :  { %3252 = vmatpush1.bf16.msra.mxu1 %v3770_v44 }
 0xef0   :  { %3262 = vmatprep.subr.bf16.mxu1 %v3683_v53 }
 0xfbd   :  { %v1663_v42 = vpop.f32.mrb[22].mxu1 }
 0xfbe   :  { %v1665_v45 = vpop.f32.mrb[23].mxu1 }
 0xfbf   :  { %v1668_v57 = vadd.f32 %v3818_v47, %v1665_v45 }
 0xfc1   :  { %v1669_v59 = vmul.f32 %v1668_v57, %v143_v62  ;;  %v1745_v23 = vmul.f32 %v1668_v57, %v769_v55  ;;  %v1751_v18 = vsub.f32 %v119_v25, %v1668_v57 }
 0xfc3   :  { %v1670_v30 = vadd.f32 %v1669_v59, %v135_v48  ;;  %v1752_v13 = vand.u32 2147483647, %v1751_v18 }
 0xfc5   :  { %3105 = vmatmul.mubr.msk.f32.vlgmr.msra.gmra.mrb[28].mxu0 %vm148_vm3, %v1670_v30 }
 0xfc6   :  { %3244 = vmatpush3.bf16.msk.msra.mxu0 %vm3570_vm2, %v3837_v2  ;;  %3111 = vmatprep.mubr.msk.f32.mxu0 %vm3467_vm5, %v3464_v17 }
 0xfc7   :  { %3253 = vmatprep.subr.bf16.mxu0 %v3466_v20 }
0x1098   :  { %v1740_v29 = vpop.f32.mrb[28].mxu0 }
0x1099   :  { %v1741_v63 = vadd.f32 %v3846_v3, %v1740_v29  ;;  %v3106_v22 = vpop.f32.mrb[29].mxu0 }
0x109b   :  { %v1744_v1 = vmul.f32 %v1741_v63, %v3802_v16  ;;  %v1753_v5 = vsub.f32 %v119_v25, %v1741_v63  ;;  %v599_v16 = vadd.f32 %v3868_v41, %v3785_v54 }
0x109d   :  { %v1746_v6 = vadd.f32 %v1745_v23, %v1744_v1  ;;  %v1754_v9 = vand.u32 2147483647, %v1753_v5  ;;  %v770_v1 = vsub.f32 1.0, %v3808_v39 }
0x109f   :  { %v1747_v28 = vmul.f32 %v1746_v6, %v143_v62  ;;  %v1755_v50 = vadd.f32 %v1754_v9, %v1752_v13  ;;  %v1756_v10 = vsub.f32 %v119_v25, %v1746_v6 }
0x10a1   :  { %v1748_v11 = vadd.f32 %v1747_v28, %v135_v48  ;;  %v1757_v32 = vand.u32 2147483647, %v1756_v10 }
0x10a3   :  { %2932 = vst.msk [vmem:[%s4313_s16 + $0x18] sm:$0xff] %vm148_vm3, %v1748_v11  ;;  %3112 = vmatmul.mubr.msk.f32.vlgmr.msra.gmra.mrb[30].mxu0 %vm148_vm3, %v1748_v11  ;;  %v4011_v51 = vadd.f32 %v1757_v32, %v1755_v50 }
0x10a4   :  { %3256 = vmatpush3.bf16.msk.msra.mxu0 %vm3570_vm2, %v3724_v19  ;;  %3118 = vmatprep.mubr.msk.f32.mxu0 %vm3467_vm5, %v3464_v17 }
0x10a5   :  { %3257 = vmatprep.subr.bf16.mxu0 %v3466_v20 }
0x1176   :  { %v1830_v8 = vpop.f32.mrb[30].mxu0 }
0x1177   :  { %v1831_v7 = vadd.f32 %v1830_v8, %v599_v16  ;;  %v3113_v24 = vpop.f32.mrb[31].mxu0 }
0x1179   :  { %v1834_v35 = vadd.f32 %v1831_v7, %v1663_v42 }
0x117b   :  { %3387 = vtanh.f32 %v1834_v35  ;;  %v2935_v31 = vmul.f32 -1.442695, %v1834_v35 }
0x117d   :  { %3389 = vpow2.f32 %v2935_v31 }
0x1185   :  { %v3388_v12 = vpop.eup %3387 }
0x1186   :  { %1844 = vrot.lane.b32.xlu1 %v3388_v12, %s3468_s2 }
0x1187   :  { %v3390_v40 = vpop.eup %3389 }
0x1188   :  { %v1838_v14 = vadd.f32 1.0, %v3390_v40 }
0x118a   :  { %3391 = vrcp.f32 %v1838_v14 }
0x1194   :  { %v3392_v62 = vpop.eup %3391 }
0x1195   :  { %v1842_v54 = vmul.f32 %v3392_v62, %v3976_v33  ;;  %v144_v33 = vsub.f32 1.0, %v3672_v43 }
0x11f8   :  { %v1845_v45 = vpop.permute.xlu1 %1844 }
0x11f9   :  { %v1847_v48 = vmul.f32 %v3392_v62, %v1845_v45 }
0x11fb   :  { %1849 = vrot.lane.b32.xlu0 %v1847_v48, %s3468_s2 }
0x11ff   :  { %1859 = vrot.lane.b32.xlu0 %v3714_v15, %s3469_s14  ;;  %v96_v15 = vld [vmem:[%s4322_s11 + $0x20] sm:$0xff] }
0x1200   :  { %v136_v22 = vmul.f32 %v3672_v43, %v96_v15  ;;  %v120_v43 = vld [vmem:[%s4300_s3 + $0x20] sm:$0xff] }
0x126d   :  { %v1850_v42 = vpop.permute.xlu0 %1849 }
0x126e   :  { %v4026_v55 = vadd.f32 %v1850_v42, %v1842_v54 }
0x1270   :  { %3393 = vtanh.f32 %v4026_v55 }
0x1271   :  { %v1860_v30 = vpop.permute.xlu0 %1859 }
0x127a   :  { %v3394_v57 = vpop.eup %3393 }
0x127b   :  { %1855 = vrot.lane.b32.xlu1 %v3394_v57, %s3468_s2 }
0x12ed   :  { %v1856_v59 = vpop.permute.xlu1 %1855 }
0x12ee   :  { %v1858_v23 = vmul.f32 %v3392_v62, %v1856_v59 }
0x12f0   :  { %v1862_v25 = vmul.f32 %v1860_v30, %v1858_v23 }
0x12f2   :  { %1864 = vrot.lane.b32.xlu1 %v1862_v25, %s3469_s14 }
0x1364   :  { %v1865_v29 = vpop.permute.xlu1 %1864 }
0x1365   :  { %2936 = vmatmul.mubr.msk.f32.vlgmr.msra.gmra.mrb[24].mxu1 %vm775_vm4, %v1865_v29 }
0x1366   :  { %3264 = vmatpush1.bf16.msra.mxu1 %v3757_v37  ;;  %2203 = vmatprep.mubr.f32.mxu1 %v3464_v17 }
0x1367   :  { %3266 = vmatprep.subr.bf16.mxu1 %v3759_v38 }
0x136a   :  { %3268 = vmatpush1.bf16.msra.mxu1 %v3770_v44 }
0x136b   :  { %3278 = vmatprep.subr.bf16.mxu1 %v3683_v53 }
0x1438   :  { %v1934_v63 = vpop.f32.mrb[24].mxu1 }
0x1439   :  { %v1936_v18 = vpop.f32.mrb[25].mxu1 }
0x143a   :  { %v1939_v5 = vadd.f32 %v3818_v47, %v1936_v18 }
0x143c   :  { %v1940_v6 = vmul.f32 %v1939_v5, %v144_v33  ;;  %v2016_v13 = vmul.f32 %v1939_v5, %v770_v1  ;;  %v2022_v10 = vsub.f32 %v120_v43, %v1939_v5 }
0x143e   :  { %v1941_v9 = vadd.f32 %v1940_v6, %v136_v22  ;;  %v2023_v7 = vand.u32 2147483647, %v2022_v10 }
0x1440   :  { %3119 = vmatmul.mubr.msk.f32.vlgmr.msra.gmra.mrb[32].mxu0 %vm148_vm3, %v1941_v9 }
0x1441   :  { %3260 = vmatpush3.bf16.msk.msra.mxu0 %vm3570_vm2, %v3837_v2  ;;  %3125 = vmatprep.mubr.msk.f32.mxu0 %vm3467_vm5, %v3464_v17 }
0x1442   :  { %3269 = vmatprep.subr.bf16.mxu0 %v3466_v20 }
0x1513   :  { %v2011_v28 = vpop.f32.mrb[32].mxu0 }
0x1514   :  { %v2012_v50 = vadd.f32 %v3846_v3, %v2011_v28  ;;  %v3120_v11 = vpop.f32.mrb[33].mxu0 }
0x1516   :  { %v2015_v32 = vmul.f32 %v2012_v50, %v3808_v39  ;;  %v2024_v16 = vsub.f32 %v120_v43, %v2012_v50  ;;  %v600_v39 = vadd.f32 %v3868_v41, %v3787_v56  ;;  %v771_v50 = vsub.f32 1.0, %v3806_v36 }
0x1518   :  { %v2017_v8 = vadd.f32 %v2016_v13, %v2015_v32  ;;  %v2025_v24 = vand.u32 2147483647, %v2024_v16 }
0x151a   :  { %v2018_v35 = vmul.f32 %v2017_v8, %v144_v33  ;;  %v2026_v12 = vadd.f32 %v2025_v24, %v2023_v7  ;;  %v2027_v31 = vsub.f32 %v120_v43, %v2017_v8 }
0x151c   :  { %v2019_v40 = vadd.f32 %v2018_v35, %v136_v22  ;;  %v2028_v14 = vand.u32 2147483647, %v2027_v31 }
0x151e   :  { %2939 = vst.msk [vmem:[%s4313_s16 + $0x20] sm:$0xff] %vm148_vm3, %v2019_v40  ;;  %3126 = vmatmul.mubr.msk.f32.vlgmr.msra.gmra.mrb[34].mxu0 %vm148_vm3, %v2019_v40  ;;  %v4061_v62 = vadd.f32 %v2028_v14, %v2026_v12 }
0x151f   :  { %3272 = vmatpush3.bf16.msk.msra.mxu0 %vm3570_vm2, %v3724_v19  ;;  %3132 = vmatprep.mubr.msk.f32.mxu0 %vm3467_vm5, %v3464_v17 }
0x1520   :  { %3273 = vmatprep.subr.bf16.mxu0 %v3466_v20 }
0x15f1   :  { %v2101_v45 = vpop.f32.mrb[34].mxu0 }
0x15f2   :  { %v2102_v48 = vadd.f32 %v2101_v45, %v600_v39  ;;  %v3127_v54 = vpop.f32.mrb[35].mxu0 }
0x15f4   :  { %v2105_v42 = vadd.f32 %v2102_v48, %v1934_v63 }
0x15f6   :  { %3395 = vtanh.f32 %v2105_v42  ;;  %v2942_v59 = vmul.f32 -1.442695, %v2105_v42 }
0x15f8   :  { %3397 = vpow2.f32 %v2942_v59 }
0x1600   :  { %v3396_v57 = vpop.eup %3395 }
0x1601   :  { %2115 = vrot.lane.b32.xlu0 %v3396_v57, %s3468_s2 }
0x1602   :  { %v3398_v23 = vpop.eup %3397 }
0x1603   :  { %v2109_v30 = vadd.f32 1.0, %v3398_v23 }
0x1605   :  { %3399 = vrcp.f32 %v2109_v30 }
0x160f   :  { %v3400_v25 = vpop.eup %3399 }
0x1610   :  { %v2113_v56 = vmul.f32 %v3400_v25, %v4026_v55  ;;  %v145_v55 = vsub.f32 1.0, %v3689_v61 }
0x1673   :  { %v2116_v29 = vpop.permute.xlu0 %2115 }
0x1674   :  { %v2118_v15 = vmul.f32 %v3400_v25, %v2116_v29 }
0x1676   :  { %2120 = vrot.lane.b32.xlu1 %v2118_v15, %s3468_s2 }
0x167a   :  { %2130 = vrot.lane.b32.xlu1 %v3727_v21, %s3469_s14  ;;  %v97_v21 = vld [vmem:[%s4322_s11 + $0x28] sm:$0xff] }
0x167b   :  { %v137_v28 = vmul.f32 %v3689_v61, %v97_v21 }
0x16e8   :  { %v2121_v33 = vpop.permute.xlu1 %2120 }
0x16e9   :  { %v4076_v63 = vadd.f32 %v2121_v33, %v2113_v56 }
0x16eb   :  { %3401 = vtanh.f32 %v4076_v63 }
0x16ec   :  { %v2131_v5 = vpop.permute.xlu1 %2130 }
0x16f5   :  { %v3402_v18 = vpop.eup %3401 }
0x16f6   :  { %2126 = vrot.lane.b32.xlu0 %v3402_v18, %s3468_s2 }
0x1768   :  { %v2127_v22 = vpop.permute.xlu0 %2126 }
0x1769   :  { %v2129_v1 = vmul.f32 %v3400_v25, %v2127_v22 }
0x176b   :  { %v2133_v6 = vmul.f32 %v2131_v5, %v2129_v1 }
0x176d   :  { %2135 = vrot.lane.b32.xlu0 %v2133_v6, %s3469_s14 }
0x17df   :  { %v2136_v13 = vpop.permute.xlu0 %2135 }
0x17e0   :  { %2943 = vmatmul.mubr.msk.f32.vlgmr.msra.gmra.mrb[26].mxu1 %vm775_vm4, %v2136_v13 }
0x17e1   :  { %3280 = vmatpush1.bf16.msra.mxu1 %v3757_v37  ;;  %2474 = vmatprep.mubr.f32.mxu1 %v3464_v17 }
0x17e2   :  { %3282 = vmatprep.subr.bf16.mxu1 %v3759_v38 }
0x17e5   :  { %3284 = vmatpush1.bf16.msra.mxu1 %v3770_v44 }
0x17e6   :  { %3294 = vmatprep.subr.bf16.mxu1 %v3683_v53  ;;  %v121_v53 = vld [vmem:[%s4300_s3 + $0x28] sm:$0xff] }
0x18b3   :  { %v2205_v9 = vpop.f32.mrb[26].mxu1 }
0x18b4   :  { %v2207_v43 = vpop.f32.mrb[27].mxu1 }
0x18b5   :  { %v2210_v10 = vadd.f32 %v3818_v47, %v2207_v43 }
0x18b7   :  { %v2211_v11 = vmul.f32 %v2210_v10, %v145_v55  ;;  %v2287_v32 = vmul.f32 %v2210_v10, %v771_v50  ;;  %v2293_v7 = vsub.f32 %v121_v53, %v2210_v10 }
0x18b9   :  { %v2212_v16 = vadd.f32 %v2211_v11, %v137_v28  ;;  %v2294_v40 = vand.u32 2147483647, %v2293_v7 }
0x18bb   :  { %3133 = vmatmul.mubr.msk.f32.vlgmr.msra.gmra.mrb[36].mxu0 %vm148_vm3, %v2212_v16 }
0x18bc   :  { %3276 = vmatpush3.bf16.msk.msra.mxu0 %vm3570_vm2, %v3837_v2  ;;  %3139 = vmatprep.mubr.msk.f32.mxu0 %vm3467_vm5, %v3464_v17 }
0x18bd   :  { %3285 = vmatprep.subr.bf16.mxu0 %v3466_v20 }
0x198e   :  { %v2282_v61 = vpop.f32.mrb[36].mxu0 }
0x198f   :  { %v2283_v8 = vadd.f32 %v3846_v3, %v2282_v61  ;;  %v3134_v24 = vpop.f32.mrb[37].mxu0 }
0x1991   :  { %v2286_v35 = vmul.f32 %v2283_v8, %v3806_v36  ;;  %v2295_v12 = vsub.f32 %v121_v53, %v2283_v8  ;;  %v601_v36 = vadd.f32 %v3868_v41, %v3789_v58 }
0x1993   :  { %v2288_v31 = vadd.f32 %v2287_v32, %v2286_v35  ;;  %v2296_v14 = vand.u32 2147483647, %v2295_v12 }
0x1995   :  { %v2289_v39 = vmul.f32 %v2288_v31, %v145_v55  ;;  %v2297_v45 = vadd.f32 %v2296_v14, %v2294_v40  ;;  %v2298_v48 = vsub.f32 %v121_v53, %v2288_v31  ;;  %v772_v31 = vsub.f32 1.0, %v3821_v49 }
0x1997   :  { %v2290_v54 = vadd.f32 %v2289_v39, %v137_v28  ;;  %v2299_v42 = vand.u32 2147483647, %v2298_v48  ;;  %v122_v48 = vld [vmem:[%s4300_s3 + $0x30] sm:$0xff] }
0x1999   :  { %2946 = vst.msk [vmem:[%s4313_s16 + $0x28] sm:$0xff] %vm148_vm3, %v2290_v54  ;;  %3140 = vmatmul.mubr.msk.f32.vlgmr.msra.gmra.mrb[38].mxu0 %vm148_vm3, %v2290_v54  ;;  %v4111_v57 = vadd.f32 %v2299_v42, %v2297_v45 }
0x199a   :  { %3288 = vmatpush3.bf16.msk.msra.mxu0 %vm3570_vm2, %v3724_v19  ;;  %3146 = vmatprep.mubr.msk.f32.mxu0 %vm3467_vm5, %v3464_v17 }
0x199b   :  { %3289 = vmatprep.subr.bf16.mxu0 %v3466_v20 }
0x1a6c   :  { %v2372_v59 = vpop.f32.mrb[38].mxu0 }
0x1a6d   :  { %v2373_v23 = vadd.f32 %v2372_v59, %v601_v36  ;;  %v3141_v30 = vpop.f32.mrb[39].mxu0 }
0x1a6f   :  { %v2376_v25 = vadd.f32 %v2373_v23, %v2205_v9 }
0x1a71   :  { %3403 = vtanh.f32 %v2376_v25  ;;  %v2949_v15 = vmul.f32 -1.442695, %v2376_v25 }
0x1a73   :  { %3405 = vpow2.f32 %v2949_v15 }
0x1a7b   :  { %v3404_v29 = vpop.eup %3403 }
0x1a7c   :  { %2386 = vrot.lane.b32.xlu1 %v3404_v29, %s3468_s2 }
0x1a7d   :  { %v3406_v56 = vpop.eup %3405 }
0x1a7e   :  { %v2380_v33 = vadd.f32 1.0, %v3406_v56 }
0x1a80   :  { %3407 = vrcp.f32 %v2380_v33 }
0x1a8a   :  { %v3408_v18 = vpop.eup %3407 }
0x1a8b   :  { %v2384_v58 = vmul.f32 %v3408_v18, %v4076_v63 }
0x1aee   :  { %v2387_v22 = vpop.permute.xlu1 %2386 }
0x1aef   :  { %v2389_v1 = vmul.f32 %v3408_v18, %v2387_v22 }
0x1af1   :  { %2391 = vrot.lane.b32.xlu0 %v2389_v1, %s3468_s2 }
0x1af5   :  { %2401 = vrot.lane.b32.xlu0 %v3732_v26, %s3469_s14  ;;  %v4134_v26 = vld [vmem:[%s4301_s4] sm:$0xff] }
0x1af6   :  { %v149_v63 = vsel %vm148_vm3, %v4134_v26, 0.0 }
0x1b63   :  { %v2392_v5 = vpop.permute.xlu0 %2391 }
0x1b64   :  { %v4126_v6 = vadd.f32 %v2392_v5, %v2384_v58 }
0x1b66   :  { %3409 = vtanh.f32 %v4126_v6 }
0x1b67   :  { %v2402_v9 = vpop.permute.xlu0 %2401 }
0x1b70   :  { %v3410_v13 = vpop.eup %3409 }
0x1b71   :  { %2397 = vrot.lane.b32.xlu1 %v3410_v13, %s3468_s2 }
0x1be3   :  { %v2398_v21 = vpop.permute.xlu1 %2397 }
0x1be4   :  { %v2400_v55 = vmul.f32 %v3408_v18, %v2398_v21 }
0x1be6   :  { %v2404_v43 = vmul.f32 %v2402_v9, %v2400_v55 }
0x1be8   :  { %2406 = vrot.lane.b32.xlu1 %v2404_v43, %s3469_s14 }
0x1c0c   :  { %150 = vadd.xlane.f32.xlu1 %v149_v63 }
0x1c5a   :  { %v2407_v28 = vpop.permute.xlu1 %2406 }
0x1c5b   :  { %2950 = vmatmul.mubr.msk.f32.vlgmr.msra.gmra.mrb[28].mxu1 %vm775_vm4, %v2407_v28 }
0x1c5c   :  { %3296 = vmatpush1.bf16.msra.mxu1 %v3757_v37  ;;  %2745 = vmatprep.mubr.f32.mxu1 %v3464_v17  ;;  %v98_v37 = vld [vmem:[%s4322_s11 + $0x30] sm:$0xff] }
0x1c5d   :  { %3298 = vmatprep.subr.bf16.mxu1 %v3759_v38  ;;  %v3435_v38 = vld [vmem:[%s4321_s24 + $0x30] sm:$0xff] }
0x1c5e   :  { %v138_v12 = vmul.f32 %v3435_v38, %v98_v37 }
0x1c60   :  { %3300 = vmatpush1.bf16.msra.mxu1 %v3770_v44  ;;  %v146_v44 = vsub.f32 1.0, %v3435_v38 }
0x1c99   :  { %v151_v50 = vpop.xlane.xlu1 %150 }
0x1c9a   :  { %v152_v10 = vrot.slane %v151_v50, 4 }
0x1c9c   :  { %v153_v11 = vadd.f32 %v152_v10, %v151_v50  ;;  %v4190_v50 = vld [vmem:[%s4301_s4 + $0x10] sm:$0xff] }
0x1c9d   :  { %v181_v10 = vsel %vm148_vm3, %v4190_v50, 0.0 }
0x1c9e   :  { %v154_v32 = vrot.slane %v153_v11, 2 }
0x1ca0   :  { %v155_v16 = vadd.f32 %v154_v32, %v153_v11 }
0x1ca2   :  { %v156_v53 = vrot.slane %v155_v16, 1 }
0x1ca4   :  { %v157_v61 = vadd.f32 %v156_v53, %v155_v16 }
0x1ca6   :  { %3305 = vpush %v157_v61 }
0x1cd7   :  { %s3306_s29 = spop %3305 }
0x1cd8   :  { %s159_s9 = sadd.f32 1e-05, %s3306_s29 }
0x1cda   :  { %v160_v8 = vstv %s159_s9 }
0x1cdb   :  { %3411 = vrcp.f32 %v160_v8  ;;  %v4197_v8 = vld [vmem:[%s4301_s4 + $0x20] sm:$0xff] }
0x1ce5   :  { %v3412_v7 = vpop.eup %3411 }
0x1ce6   :  { %3307 = vpush %v3412_v7  ;;  %v213_v7 = vsel %vm148_vm3, %v4197_v8, 0.0 }
0x1d2e   :  { %v2476_v24 = vpop.f32.mrb[28].mxu1 }
0x1d2f   :  { %v2478_v35 = vpop.f32.mrb[29].mxu1 }
0x1d30   :  { %v2481_v40 = vadd.f32 %v3818_v47, %v2478_v35 }
0x1d32   :  { %v2482_v14 = vmul.f32 %v2481_v40, %v146_v44  ;;  %v2558_v39 = vmul.f32 %v2481_v40, %v772_v31  ;;  %v2564_v42 = vsub.f32 %v122_v48, %v2481_v40  ;;  %v4205_v31 = vld [vmem:[%s4301_s4 + $0x28] sm:$0xff] }
0x1d33   :  { %v229_v40 = vsel %vm148_vm3, %v4205_v31, 0.0 }
0x1d34   :  { %v2483_v45 = vadd.f32 %v2482_v14, %v138_v12  ;;  %v2565_v25 = vand.u32 2147483647, %v2564_v42  ;;  %v4212_v14 = vld [vmem:[%s4301_s4 + $0x18] sm:$0xff] }
0x1d36   :  { %3147 = vmatmul.mubr.msk.f32.vlgmr.msra.gmra.mrb[40].mxu0 %vm148_vm3, %v2483_v45 }
0x1d37   :  { %3292 = vmatpush3.bf16.msk.msra.mxu0 %vm3570_vm2, %v3837_v2  ;;  %3153 = vmatprep.mubr.msk.f32.mxu0 %vm3467_vm5, %v3464_v17 }
0x1d38   :  { %3301 = vmatprep.subr.bf16.mxu0 %v3466_v20 }
0x1e09   :  { %v2553_v54 = vpop.f32.mrb[40].mxu0 }
0x1e0a   :  { %v2554_v47 = vadd.f32 %v3846_v3, %v2553_v54  ;;  %v3148_v36 = vpop.f32.mrb[41].mxu0 }
0x1e0c   :  { %v2557_v59 = vmul.f32 %v2554_v47, %v3821_v49  ;;  %v2566_v23 = vsub.f32 %v122_v48, %v2554_v47  ;;  %v602_v49 = vadd.f32 %v3868_v41, %v3791_v60 }
0x1e0e   :  { %v2559_v30 = vadd.f32 %v2558_v39, %v2557_v59  ;;  %v2567_v2 = vand.u32 2147483647, %v2566_v23  ;;  %v197_v39 = vsel %vm148_vm3, %v4212_v14, 0.0 }
0x1e10   :  { %v2560_v29 = vmul.f32 %v2559_v30, %v146_v44  ;;  %v2568_v15 = vadd.f32 %v2567_v2, %v2565_v25  ;;  %v2569_v56 = vsub.f32 %v122_v48, %v2559_v30  ;;  %v4222_v2 = vld [vmem:[%s4301_s4 + $0x30] sm:$0xff] }
0x1e12   :  { %v2561_v33 = vadd.f32 %v2560_v29, %v138_v12  ;;  %v2570_v20 = vand.u32 2147483647, %v2569_v56 }
0x1e14   :  { %2953 = vst.msk [vmem:[%s4313_s16 + $0x30] sm:$0xff] %vm148_vm3, %v2561_v33  ;;  %3154 = vmatmul.mubr.msk.f32.vlgmr.msra.gmra.mrb[42].mxu0 %vm148_vm3, %v2561_v33  ;;  %v4168_v3 = vadd.f32 %v2570_v20, %v2568_v15 }
0x1e15   :  { %3304 = vmatpush3.bf16.msk.msra.mxu0 %vm3570_vm2, %v3724_v19  ;;  %3160 = vmatprep.mubr.msk.f32.mxu0 %vm3467_vm5, %v3464_v17  ;;  %v125_v17 = vld [vmem:[%s4301_s4 + $0x8] sm:$0xff] }
0x1e16   :  { %v165_v60 = vsel %vm148_vm3, %v125_v17, 0.0 }
0x1ee7   :  { %v2643_v18 = vpop.f32.mrb[42].mxu0 }
0x1ee8   :  { %v2644_v22 = vadd.f32 %v2643_v18, %v602_v49  ;;  %v3155_v1 = vpop.f32.mrb[43].mxu0 }
0x1eea   :  { %v2647_v58 = vadd.f32 %v2644_v22, %v2476_v24 }
0x1eec   :  { %3413 = vtanh.f32 %v2647_v58  ;;  %v2956_v13 = vmul.f32 -1.442695, %v2647_v58 }
0x1eee   :  { %3415 = vpow2.f32 %v2956_v13 }
0x1ef6   :  { %v3414_v5 = vpop.eup %3413 }
0x1ef7   :  { %2657 = vrot.lane.b32.xlu0 %v3414_v5, %s3468_s2 }
0x1ef8   :  { %v3416_v21 = vpop.eup %3415 }
0x1ef9   :  { %v2651_v55 = vadd.f32 1.0, %v3416_v21 }
0x1efb   :  { %3417 = vrcp.f32 %v2651_v55 }
0x1f05   :  { %v3418_v4 = vpop.eup %3417 }
0x1f06   :  { %v2655_v41 = vmul.f32 %v3418_v4, %v4126_v6 }
0x1f69   :  { %v2658_v19 = vpop.permute.xlu0 %2657 }
0x1f6a   :  { %v2660_v9 = vmul.f32 %v3418_v4, %v2658_v19 }
0x1f6c   :  { %2662 = vrot.lane.b32.xlu0 %v2660_v9, %s3468_s2 }
0x1f8b   :  { %166 = vadd.xlane.f32.xlu0 %v165_v60 }
0x1fa1   :  { %2672 = vrot.lane.b32.xlu0 %v3737_v27, %s3469_s14 }
0x1fde   :  { %v2663_v43 = vpop.permute.xlu0 %2662 }
0x1fdf   :  { %v2665_v63 = vadd.f32 %v2663_v43, %v2655_v41 }
0x1fe1   :  { %3419 = vtanh.f32 %v2665_v63 }
0x1feb   :  { %v3420_v28 = vpop.eup %3419 }
0x1fec   :  { %2668 = vrot.lane.b32.xlu1 %v3420_v28, %s3468_s2  ;;  %s3308_s2 = spop %3307 }
0x1fed   :  { %v163_v45 = vstv %s3308_s2 }
0x1fee   :  { %v164_v48 = vmul.f32 %v163_v45, %v4134_v26  ;;  %v245_v26 = vsel %vm148_vm3, %v4222_v2, 0.0 }
0x1ff0   :  { %v943_v42 = vmul.f32 %v3857_v52, %v164_v48 }
0x2010   :  { %182 = vadd.xlane.f32.xlu1 %v181_v10 }
0x2014   :  { %214 = vadd.xlane.f32.xlu1 %v213_v7 }
0x2018   :  { %v167_v11 = vpop.xlane.xlu0 %166  ;;  %230 = vadd.xlane.f32.xlu1 %v229_v40  ;;  %v99_v40 = vld [vmem:[%s4322_s11 + $0x38] sm:$0xff] }
0x2019   :  { %v168_v32 = vrot.slane %v167_v11, 4 }
0x201b   :  { %v169_v27 = vadd.f32 %v168_v32, %v167_v11 }
0x201c   :  { %v2673_v24 = vpop.permute.xlu0 %2672 }
0x201d   :  { %v170_v16 = vrot.slane %v169_v27, 2 }
0x201f   :  { %v171_v6 = vadd.f32 %v170_v16, %v169_v27 }
0x2021   :  { %v172_v53 = vrot.slane %v171_v6, 1 }
0x2023   :  { %v173_v61 = vadd.f32 %v172_v53, %v171_v6 }
0x2025   :  { %3309 = vpush %v173_v61 }
0x2056   :  { %s3310_s23 = spop %3309 }
0x2057   :  { %s175_s25 = sadd.f32 1e-05, %s3310_s23 }
0x2059   :  { %v176_v37 = vstv %s175_s25 }
0x205a   :  { %3421 = vrcp.f32 %v176_v37 }
0x205e   :  { %v2669_v38 = vpop.permute.xlu1 %2668 }
0x205f   :  { %v2671_v44 = vmul.f32 %v3418_v4, %v2669_v38 }
0x2061   :  { %v2675_v35 = vmul.f32 %v2673_v24, %v2671_v44 }
0x2063   :  { %2677 = vrot.lane.b32.xlu0 %v2675_v35, %s3469_s14 }
0x2064   :  { %v3422_v12 = vpop.eup %3421 }
0x2065   :  { %3311 = vpush %v3422_v12 }
0x2082   :  { %198 = vadd.xlane.f32.xlu0 %v197_v39 }
0x2086   :  { %246 = vadd.xlane.f32.xlu0 %v245_v26 }
0x2096   :  { %s3312_s14 = spop %3311 }
0x2097   :  { %v179_v54 = vstv %s3312_s14 }
0x2098   :  { %v180_v47 = vmul.f32 %v179_v54, %v125_v17  ;;  %v773_v54 = vsub.f32 1.0, %v3813_v46 }
0x209a   :  { %v1217_v36 = vmul.f32 %v3911_v34, %v180_v47  ;;  %v4230_v34 = vld [vmem:[%s4301_s4 + $0x38] sm:$0xff]  ;;  %v3437_v47 = vld [vmem:[%s4305_s8] ss:$0 sm:$0xff] }
0x209b   :  { %v261_v49 = vsel %vm148_vm3, %v4230_v34, 0.0 }
0x209c   :  { %v1218_v59 = vadd.f32 %v1217_v36, %v943_v42  ;;  %262 = vadd.xlane.f32.xlu1 %v261_v49 }
0x209d   :  { %v183_v23 = vpop.xlane.xlu1 %182 }
0x209e   :  { %v184_v30 = vrot.slane %v183_v23, 4 }
0x20a0   :  { %v185_v25 = vadd.f32 %v184_v30, %v183_v23 }
0x20a1   :  { %v215_v60 = vpop.xlane.xlu1 %214 }
0x20a2   :  { %v186_v29 = vrot.slane %v185_v25, 2  ;;  %v216_v41 = vrot.slane %v215_v60, 4 }
0x20a4   :  { %v187_v15 = vadd.f32 %v186_v29, %v185_v25  ;;  %v217_v43 = vadd.f32 %v216_v41, %v215_v60 }
0x20a5   :  { %v231_v16 = vpop.xlane.xlu1 %230 }
0x20a6   :  { %v188_v56 = vrot.slane %v187_v15, 1  ;;  %v218_v63 = vrot.slane %v217_v43, 2  ;;  %v232_v6 = vrot.slane %v231_v16, 4 }
0x20a8   :  { %v189_v33 = vadd.f32 %v188_v56, %v187_v15  ;;  %v219_v10 = vadd.f32 %v218_v63, %v217_v43 }
0x20aa   :  { %3313 = vpush %v189_v33  ;;  %v220_v11 = vrot.slane %v219_v10, 1 }
0x20ac   :  { %v221_v27 = vadd.f32 %v220_v11, %v219_v10  ;;  %v123_v11 = vld [vmem:[%s4300_s3 + $0x38] sm:$0xff] }
0x20d5   :  { %v2678_v52 = vpop.permute.xlu0 %2677 }
0x20d6   :  { %2957 = vmatmul.mubr.msk.f32.vlgmr.msra.gmra.mrb[30].mxu1 %vm775_vm4, %v2678_v52 }
0x20db   :  { %s3314_s0 = spop %3313 }
0x20dc   :  { %s191_s30 = sadd.f32 1e-05, %s3314_s0 }
0x20de   :  { %v192_v20 = vstv %s191_s30 }
0x20df   :  { %3423 = vrcp.f32 %v192_v20 }
0x20e9   :  { %v3424_v18 = vpop.eup %3423 }
0x20ea   :  { %3315 = vpush %v3424_v18 }
0x210f   :  { %v199_v22 = vpop.xlane.xlu0 %198 }
0x2110   :  { %v200_v1 = vrot.slane %v199_v22, 4 }
0x2112   :  { %v201_v58 = vadd.f32 %v200_v1, %v199_v22 }
0x2113   :  { %v247_v30 = vpop.xlane.xlu0 %246 }
0x2114   :  { %v202_v5 = vrot.slane %v201_v58, 2  ;;  %v248_v25 = vrot.slane %v247_v30, 4 }
0x2116   :  { %v203_v13 = vadd.f32 %v202_v5, %v201_v58  ;;  %v249_v29 = vadd.f32 %v248_v25, %v247_v30 }
0x2118   :  { %v204_v21 = vrot.slane %v203_v13, 1  ;;  %v250_v56 = vrot.slane %v249_v29, 2 }
0x211a   :  { %v205_v55 = vadd.f32 %v204_v21, %v203_v13  ;;  %v251_v49 = vadd.f32 %v250_v56, %v249_v29 }
0x211b   :  { %s3316_s6 = spop %3315 }
0x211c   :  { %v195_v4 = vstv %s3316_s6  ;;  %3317 = vpush %v205_v55  ;;  %v252_v18 = vrot.slane %v251_v49, 1 }
0x211d   :  { %v196_v19 = vmul.f32 %v195_v4, %v4190_v50  ;;  %v233_v50 = vadd.f32 %v232_v6, %v231_v16 }
0x211e   :  { %v253_v1 = vadd.f32 %v252_v18, %v251_v49 }
0x211f   :  { %v1488_v9 = vmul.f32 %v3961_v0, %v196_v19  ;;  %v234_v61 = vrot.slane %v233_v50, 2 }
0x2121   :  { %v1489_v17 = vadd.f32 %v1488_v9, %v1218_v59  ;;  %v235_v44 = vadd.f32 %v234_v61, %v233_v50 }
0x2123   :  { %v236_v24 = vrot.slane %v235_v44, 1 }
0x2125   :  { %v237_v12 = vadd.f32 %v236_v24, %v235_v44 }
0x2129   :  { %v263_v58 = vpop.xlane.xlu1 %262 }
0x212a   :  { %v264_v5 = vrot.slane %v263_v58, 4 }
0x212c   :  { %v265_v13 = vadd.f32 %v264_v5, %v263_v58 }
0x212e   :  { %v266_v55 = vrot.slane %v265_v13, 2 }
0x2130   :  { %v267_v9 = vadd.f32 %v266_v55, %v265_v13 }
0x214d   :  { %s3318_s4 = spop %3317 }
0x214e   :  { %s207_s19 = sadd.f32 1e-05, %s3318_s4 }
0x2150   :  { %v208_v28 = vstv %s207_s19 }
0x2151   :  { %3425 = vrcp.f32 %v208_v28 }
0x215b   :  { %v3426_v32 = vpop.eup %3425 }
0x215c   :  { %3319 = vpush %v3426_v32 }
0x215d   :  { %3321 = vpush %v221_v27  ;;  %v3438_v27 = vld [vmem:[%s4307_s10] ss:$0 sm:$0xff] }
0x218d   :  { %s3320_s1 = spop %3319 }
0x218e   :  { %v211_v0 = vstv %s3320_s1  ;;  %s3322_s20 = spop %3321 }
0x218f   :  { %v212_v53 = vmul.f32 %v211_v0, %v4212_v14  ;;  %s223_s21 = sadd.f32 1e-05, %s3322_s20  ;;  %v4244_v14 = vld [vmem:[%s4321_s24 + $0x38] sm:$0xff] }
0x2190   :  { %v4248_v48 = vmul.f32 %v4244_v14, %v99_v40 }
0x2191   :  { %v1759_v7 = vmul.f32 %v4011_v51, %v212_v53  ;;  %v224_v37 = vstv %s223_s21  ;;  %v147_v51 = vsub.f32 1.0, %v4244_v14 }
0x2192   :  { %3427 = vrcp.f32 %v224_v37 }
0x2193   :  { %v1760_v38 = vadd.f32 %v1759_v7, %v1489_v17  ;;  %v268_v17 = vrot.slane %v267_v9, 1 }
0x2195   :  { %v269_v41 = vadd.f32 %v268_v17, %v267_v9 }
0x219c   :  { %v3428_v35 = vpop.eup %3427 }
0x219d   :  { %3323 = vpush %v3428_v35 }
0x219e   :  { %3325 = vpush %v237_v12 }
0x21a9   :  { %v2747_v39 = vpop.f32.mrb[30].mxu1 }
0x21aa   :  { %v2748_v45 = vpop.f32.mrb[31].mxu1 }
0x21ab   :  { %v4254_v42 = vadd.f32 %v3437_v47, %v2748_v45 }
0x21ad   :  { %v2752_v36 = vmul.f32 %v4254_v42, %v147_v51  ;;  %v2828_v59 = vmul.f32 %v4254_v42, %v773_v54 }
0x21af   :  { %v2753_v23 = vadd.f32 %v2752_v36, %v4248_v48 }
0x21b1   :  { %3161 = vmatmul.mubr.msk.f32.vlgmr.msra.gmra.mrb[44].mxu0 %vm148_vm3, %v2753_v23 }
0x21ce   :  { %s3324_s24 = spop %3323 }
0x21cf   :  { %v227_v26 = vstv %s3324_s24  ;;  %s3326_s11 = spop %3325 }
0x21d0   :  { %v228_v15 = vmul.f32 %v227_v26, %v4197_v8  ;;  %s239_s8 = sadd.f32 1e-05, %s3326_s11 }
0x21d2   :  { %v2030_v33 = vmul.f32 %v4061_v62, %v228_v15  ;;  %v240_v52 = vstv %s239_s8 }
0x21d3   :  { %3429 = vrcp.f32 %v240_v52 }
0x21d4   :  { %v2031_v20 = vadd.f32 %v2030_v33, %v1760_v38 }
0x21dd   :  { %v3430_v22 = vpop.eup %3429 }
0x21de   :  { %3327 = vpush %v3430_v22 }
0x21df   :  { %3329 = vpush %v253_v1 }
0x220f   :  { %s3328_s25 = spop %3327 }
0x2210   :  { %v243_v21 = vstv %s3328_s25  ;;  %s3330_s26 = spop %3329 }
0x2211   :  { %v244_v8 = vmul.f32 %v243_v21, %v4205_v31  ;;  %s255_s27 = sadd.f32 1e-05, %s3330_s26 }
0x2213   :  { %v2301_v62 = vmul.f32 %v4111_v57, %v244_v8  ;;  %v256_v4 = vstv %s255_s27 }
0x2214   :  { %3431 = vrcp.f32 %v256_v4 }
0x2215   :  { %v2302_v19 = vadd.f32 %v2301_v62, %v2031_v20 }
0x221e   :  { %v3432_v60 = vpop.eup %3431 }
0x221f   :  { %3331 = vpush %v3432_v60 }
0x2220   :  { %3333 = vpush %v269_v41 }
0x2250   :  { %s3332_s28 = spop %3331 }
0x2251   :  { %v259_v43 = vstv %s3332_s28  ;;  %s3334_s29 = spop %3333 }
0x2252   :  { %v260_v63 = vmul.f32 %v259_v43, %v4222_v2  ;;  %s271_s14 = sadd.f32 1e-05, %s3334_s29  ;;  %v2834_v2 = vsub.f32 %v123_v11, %v4254_v42 }
0x2254   :  { %v2572_v31 = vmul.f32 %v4168_v3, %v260_v63  ;;  %v272_v28 = vstv %s271_s14  ;;  %v2835_v53 = vand.u32 2147483647, %v2834_v2 }
0x2255   :  { %3433 = vrcp.f32 %v272_v28 }
0x2256   :  { %v2573_v57 = vadd.f32 %v2572_v31, %v2302_v19 }
0x225f   :  { %v3434_v10 = vpop.eup %3433 }
0x2260   :  { %3335 = vpush %v3434_v10 }
0x2284   :  { %v2823_v32 = vpop.f32.mrb[44].mxu0 }
0x2285   :  { %v2824_v16 = vadd.f32 %v3438_v27, %v2823_v32  ;;  %v3162_v6 = vpop.f32.mrb[45].mxu0 }
0x2287   :  { %v2827_v3 = vmul.f32 %v2824_v16, %v3813_v46  ;;  %v2836_v50 = vsub.f32 %v123_v11, %v2824_v16 }
0x2289   :  { %v2829_v0 = vadd.f32 %v2828_v59, %v2827_v3  ;;  %v2837_v61 = vand.u32 2147483647, %v2836_v50 }
0x228b   :  { %v2830_v7 = vmul.f32 %v2829_v0, %v147_v51  ;;  %v2838_v37 = vadd.f32 %v2837_v61, %v2835_v53  ;;  %v2839_v38 = vsub.f32 %v123_v11, %v2829_v0 }
0x228d   :  { %v2831_v44 = vadd.f32 %v2830_v7, %v4248_v48  ;;  %v2840_v24 = vand.u32 2147483647, %v2839_v38 }
0x228f   :  { %2960 = vst.msk [vmem:[%s4313_s16 + $0x38] sm:$0xff] %vm148_vm3, %v2831_v44  ;;  %v2841_v35 = vadd.f32 %v2840_v24, %v2838_v37  ;;  %s2866_s16 = sshll.u32 %s3470_s15, 4  ;;  %s2867_s16 = int_to_ptr.vmem [resolvable:$true] %s2866_s16 }
0x2290   :  { %s3439_s4 = scalar_lea.vmem %s2867_s16, 16  ;;  %s3443_s19 = scalar_lea.vmem %s2867_s16, 32 }
0x2291   :  { %s3336_s18 = spop %3335  ;;  %p3440_p0 = scmp.ne.s32.totalorder %s2867_s16, %s3439_s4 }
0x2292   :  { %v275_v46 = vstv %s3336_s18  ;;  %p3444_p1 = scmp.lt.s32.totalorder %s2867_s16, %s2867_s16  ;;  %p3445_p2 = scmp.lt.s32.totalorder %s3443_s19, %s3439_s4 }
0x2293   :  { %v276_v12 = vmul.f32 %v275_v46, %v4230_v34 }
0x2294   :  { %p3446_p3 = por %p3445_p2, %p3444_p1 }
0x2295   :  { %v2842_v40 = vmul.f32 %v2841_v35, %v276_v12 }
0x2296   :  { %p3447_p4 = pnand %p3446_p3, %p3440_p0 }
0x2297   :  { %v2843_v39 = vadd.f32 %v2842_v40, %v2573_v57 }
0x2299   :  { %v2844_v14 = vsel %vm148_vm3, %v2843_v39, 0.0 }
0x229a   :  { %2845 = vadd.xlane.f32.xlu0 %v2844_v14 }
0x2327   :  { %v2846_v51 = vpop.xlane.xlu0 %2845 }
0x2328   :  { %v2847_v45 = vrot.slane %v2846_v51, 4 }
0x232a   :  { %v2848_v54 = vadd.f32 %v2847_v45, %v2846_v51 }
0x232c   :  { %v2849_v48 = vrot.slane %v2848_v54, 2 }
0x232e   :  { %v2850_v47 = vadd.f32 %v2849_v48, %v2848_v54 }
0x2330   :  { %v2851_v42 = vrot.slane %v2850_v47, 1 }
0x2332   :  { %v2852_v36 = vadd.f32 %v2851_v42, %v2850_v47 }
0x2334   :  { %3337 = vpush %v2852_v36 }
0x2365   :  { %s3338_s6 = spop %3337 }
0x2366   :  { %v2854_v59 = vstv %s3338_s6 }
0x2367   :  { %2857 = vst.msk [vmem:[#allocation2] sm:$0x1] %vm2856_vm6, %v2854_v59 }
0x2368   :  { %3450 = shalt.err (!%p3447_p4)
}
0x2369   :  { %s3451_s21 = scalar_lea.hbm %s4314_s17, 16 }
0x236a   :  { %p3452_p5 = scmp.ne.s32.totalorder %s4314_s17, %s3451_s21  ;;  %p3455_p6 = scmp.lt.u32.totalorder %s3451_s21, %s4314_s17 }
0x236c   :  { %p3457_p7 = pnand %p3455_p6, %p3452_p5 }
0x236e   :  { %3460 = shalt.err (!%p3457_p7)
}
0x236f   :  { %2869 = dma.vmem_to_hbm [thread:$0]  %s2867_s16, 16, %s4314_s17, [#allocation3]  }
0x2370   :  { %3461 = dma.done.wait [#allocation3], 16  }
0x2371   :  { %3462 = vsyncadd [#allocation3], 4294967280 }
0x2372   :  { %2875 = vsyncpa [#allocation3], 1 }

</bundles_post_ra>
